<compile_context>
chip_gen: v5e
topology: v5e:2x2
jax: 0.10.0
libtpu: 0.0.40
codegen_flags: <defaults>
</compile_context>

<pallas_src>
import functools
import math

import jax
import jax.numpy as jnp
from jax.experimental import pallas as pl
from jax.experimental.pallas import tpu as pltpu


# -----------------------------------------------------------------------------
# Kernels
# -----------------------------------------------------------------------------
def _self_attn_kernel(x_ref, f0_ref, f1_ref, wqkv_ref, bqkv_ref, wout_ref,
                      bout_ref, msg_ref, *, num_heads, head_dim, scale):
    f32 = jnp.float32
    x = x_ref[0].astype(f32)                    # (N, D)
    f0 = f0_ref[0].astype(f32)                  # (N, hd)  (already permuted to half-split)
    f1 = f1_ref[0].astype(f32)
    qkv = jnp.dot(x, wqkv_ref[...].astype(f32), preferred_element_type=f32)
    qkv = qkv + bqkv_ref[...].astype(f32)       # (N, 3D), layout [q | k | v], heads contiguous
    D = num_heads * head_dim
    half = head_dim // 2

    def rot_half(t):  # half-split rotate_half (layout pre-permuted in the wrapper)
        return jnp.concatenate([-t[:, half:], t[:, :half]], axis=-1)

    ctx_heads = []
    for h in range(num_heads):
        lo = h * head_dim
        q = qkv[:, lo:lo + head_dim]
        k = qkv[:, D + lo:D + lo + head_dim]
        v = qkv[:, 2 * D + lo:2 * D + lo + head_dim]
        q = q * f0 + rot_half(q) * f1
        k = k * f0 + rot_half(k) * f1
        s = jax.lax.dot_general(q, k, (((1,), (1,)), ((), ())),
                                preferred_element_type=f32) * scale      # (N, N)
        s = s - jnp.max(s, axis=-1, keepdims=True)
        p = jnp.exp(s)
        p = p / jnp.sum(p, axis=-1, keepdims=True)
        ctx_heads.append(jnp.dot(p, v, preferred_element_type=f32))
    ctx = jnp.concatenate(ctx_heads, axis=-1)                            # (N, D)
    msg = jnp.dot(ctx, wout_ref[...].astype(f32), preferred_element_type=f32)
    msg = msg + bout_ref[...].astype(f32)
    msg_ref[0] = msg.astype(msg_ref.dtype)


def _cross_attn_kernel(x0_ref, x1_ref, wqk_ref, bqk_ref, wv_ref, bv_ref,
                       wout_ref, bout_ref, m0_ref, m1_ref, *,
                       num_heads, head_dim, scale_half):
    f32 = jnp.float32
    x0 = x0_ref[0].astype(f32)                  # (N0, D)
    x1 = x1_ref[0].astype(f32)                  # (N1, D)
    wqk = wqk_ref[...].astype(f32)
    bqk = bqk_ref[...].astype(f32)
    wv = wv_ref[...].astype(f32)
    bv = bv_ref[...].astype(f32)
    qk0 = jnp.dot(x0, wqk, preferred_element_type=f32) + bqk
    qk1 = jnp.dot(x1, wqk, preferred_element_type=f32) + bqk
    v0 = jnp.dot(x0, wv, preferred_element_type=f32) + bv
    v1 = jnp.dot(x1, wv, preferred_element_type=f32) + bv

    def softmax_last(s):
        s = s - jnp.max(s, axis=-1, keepdims=True)
        e = jnp.exp(s)
        return e / jnp.sum(e, axis=-1, keepdims=True)

    ctx0, ctx1 = [], []
    for h in range(num_heads):
        lo = h * head_dim
        a0 = qk0[:, lo:lo + head_dim] * scale_half
        a1 = qk1[:, lo:lo + head_dim] * scale_half
        s01 = jax.lax.dot_general(a0, a1, (((1,), (1,)), ((), ())),
                                  preferred_element_type=f32)            # (N0, N1)
        s10 = jax.lax.dot_general(a1, a0, (((1,), (1,)), ((), ())),
                                  preferred_element_type=f32)            # (N1, N0)
        p01 = softmax_last(s01)
        p10 = softmax_last(s10)
        ctx0.append(jnp.dot(p01, v1[:, lo:lo + head_dim], preferred_element_type=f32))
        ctx1.append(jnp.dot(p10, v0[:, lo:lo + head_dim], preferred_element_type=f32))
    wout = wout_ref[...].astype(f32)
    bout = bout_ref[...].astype(f32)
    m0 = jnp.dot(jnp.concatenate(ctx0, -1), wout, preferred_element_type=f32) + bout
    m1 = jnp.dot(jnp.concatenate(ctx1, -1), wout, preferred_element_type=f32) + bout
    m0_ref[0] = m0.astype(m0_ref.dtype)
    m1_ref[0] = m1.astype(m1_ref.dtype)


def _ffn_residual_kernel(x_ref, m_ref, w1a_ref, w1b_ref, b1_ref, g_ref, bt_ref,
                         w2_ref, b2_ref, o_ref):
    f32 = jnp.float32
    x = x_ref[...].astype(f32)                  # (TM, D)
    m = m_ref[...].astype(f32)                  # (TM, D)
    # cat([x, m]) @ W1.T  ==  x @ W1a.T + m @ W1b.T  (W1 split in the wrapper)
    h = (jnp.dot(x, w1a_ref[...].astype(f32), preferred_element_type=f32)
         + jnp.dot(m, w1b_ref[...].astype(f32), preferred_element_type=f32)
         + b1_ref[...].astype(f32))             # (TM, 2D)
    mu = jnp.mean(h, axis=-1, keepdims=True)
    var = jnp.mean((h - mu) * (h - mu), axis=-1, keepdims=True)
    h = (h - mu) * jax.lax.rsqrt(var + 1e-5)
    h = h * g_ref[...].astype(f32) + bt_ref[...].astype(f32)
    # GELU (tanh approximation).
    # TODO(synk): PyTorch nn.GELU() defaults to the exact erf form; tanh approx used here.
    c = 0.7978845608028654  # sqrt(2/pi)
    h = 0.5 * h * (1.0 + jnp.tanh(c * (h + 0.044715 * h * h * h)))
    y = jnp.dot(h, w2_ref[...].astype(f32), preferred_element_type=f32)
    y = y + b2_ref[...].astype(f32)
    o_ref[...] = (x + y).astype(o_ref.dtype)


# -----------------------------------------------------------------------------
# pallas_call wrappers
# -----------------------------------------------------------------------------
def _self_attn_call(x, f0, f1, sp, num_heads, head_dim):
    Bt, N, D = x.shape
    hd = head_dim
    kernel = functools.partial(_self_attn_kernel, num_heads=num_heads,
                               head_dim=hd, scale=1.0 / math.sqrt(hd))
    return pl.pallas_call(
        kernel,
        out_shape=jax.ShapeDtypeStruct((Bt, N, D), x.dtype),
        grid_spec=pltpu.PrefetchScalarGridSpec(
            num_scalar_prefetch=0,
            grid=(Bt,),
            in_specs=[
                pl.BlockSpec((1, N, D), lambda b: (b, 0, 0)),
                pl.BlockSpec((1, N, hd), lambda b: (b, 0, 0)),
                pl.BlockSpec((1, N, hd), lambda b: (b, 0, 0)),
                pl.BlockSpec((D, 3 * D), lambda b: (0, 0)),
                pl.BlockSpec((1, 3 * D), lambda b: (0, 0)),
                pl.BlockSpec((D, D), lambda b: (0, 0)),
                pl.BlockSpec((1, D), lambda b: (0, 0)),
            ],
            out_specs=pl.BlockSpec((1, N, D), lambda b: (b, 0, 0)),
        ),
        compiler_params=pltpu.CompilerParams(dimension_semantics=("parallel",)),
    )(x, f0, f1, sp["wqkvT"], sp["bqkv"], sp["woutT"], sp["bout"])


def _cross_attn_call(x0, x1, cp, num_heads, head_dim):
    B, N, D = x0.shape
    kernel = functools.partial(_cross_attn_kernel, num_heads=num_heads,
                               head_dim=head_dim,
                               scale_half=float(head_dim) ** -0.25)
    return pl.pallas_call(
        kernel,
        out_shape=(jax.ShapeDtypeStruct((B, N, D), x0.dtype),
                   jax.ShapeDtypeStruct((B, N, D), x1.dtype)),
        grid_spec=pltpu.PrefetchScalarGridSpec(
            num_scalar_prefetch=0,
            grid=(B,),
            in_specs=[
                pl.BlockSpec((1, N, D), lambda b: (b, 0, 0)),
                pl.BlockSpec((1, N, D), lambda b: (b, 0, 0)),
                pl.BlockSpec((D, D), lambda b: (0, 0)),
                pl.BlockSpec((1, D), lambda b: (0, 0)),
                pl.BlockSpec((D, D), lambda b: (0, 0)),
                pl.BlockSpec((1, D), lambda b: (0, 0)),
                pl.BlockSpec((D, D), lambda b: (0, 0)),
                pl.BlockSpec((1, D), lambda b: (0, 0)),
            ],
            out_specs=[pl.BlockSpec((1, N, D), lambda b: (b, 0, 0)),
                       pl.BlockSpec((1, N, D), lambda b: (b, 0, 0))],
        ),
        compiler_params=pltpu.CompilerParams(dimension_semantics=("parallel",)),
    )(x0, x1, cp["wqkT"], cp["bqk"], cp["wvT"], cp["bv"], cp["woutT"], cp["bout"])


def _ffn_call(x, m, fp):
    Bt, N, D = x.shape
    M = Bt * N
    xf = x.reshape(M, D)
    mf = m.reshape(M, D)
    TM = M if M <= 512 else 512   # row tiles; full extent at small M, 512-row tiles at scale
    out = pl.pallas_call(
        _ffn_residual_kernel,
        out_shape=jax.ShapeDtypeStruct((M, D), x.dtype),
        grid_spec=pltpu.PrefetchScalarGridSpec(
            num_scalar_prefetch=0,
            grid=(pl.cdiv(M, TM),),
            in_specs=[
                pl.BlockSpec((TM, D), lambda i: (i, 0)),
                pl.BlockSpec((TM, D), lambda i: (i, 0)),
                pl.BlockSpec((D, 2 * D), lambda i: (0, 0)),
                pl.BlockSpec((D, 2 * D), lambda i: (0, 0)),
                pl.BlockSpec((1, 2 * D), lambda i: (0, 0)),
                pl.BlockSpec((1, 2 * D), lambda i: (0, 0)),
                pl.BlockSpec((1, 2 * D), lambda i: (0, 0)),
                pl.BlockSpec((2 * D, D), lambda i: (0, 0)),
                pl.BlockSpec((1, D), lambda i: (0, 0)),
            ],
            out_specs=pl.BlockSpec((TM, D), lambda i: (i, 0)),
        ),
        compiler_params=pltpu.CompilerParams(dimension_semantics=("parallel",)),
    )(xf, mf, fp["w1aT"], fp["w1bT"], fp["b1"], fp["gamma"], fp["beta"],
      fp["w2T"], fp["b2"])
    return out.reshape(Bt, N, D)


@functools.partial(jax.jit, static_argnames=("num_heads",))
def transformer_layer_forward(kp, desc0, desc1, encoding0, encoding1, *, num_heads):
    """TransformerLayer.forward (unmasked path). encodings: (2, B, 1, N, head_dim)."""
    B, N, D = desc0.shape
    head_dim = D // num_heads
    # --- SelfBlock (shared weights) on both descriptor sets, fused along batch ---
    x = jnp.concatenate([desc0, desc1], axis=0)                 # (2B, N, D)
    enc = jnp.concatenate([encoding0, encoding1], axis=1)       # (2, 2B, 1, N, hd)
    perm = kp["self"]["perm"]
    f0 = enc[0, :, 0][..., perm]                                # (2B, N, hd), half-split layout
    f1 = enc[1, :, 0][..., perm]
    msg = _self_attn_call(x, f0, f1, kp["self"], num_heads, head_dim)
    x = _ffn_call(x, msg, kp["self"]["ffn"])                    # residual inside
    d0, d1 = x[:B], x[B:]
    # --- CrossBlock ---
    m0, m1 = _cross_attn_call(d0, d1, kp["cross"], num_heads, head_dim)
    out = _ffn_call(jnp.concatenate([d0, d1], axis=0),
                    jnp.concatenate([m0, m1], axis=0),
                    kp["cross"]["ffn"])
    return out[:B], out[B:]
    # TODO(synk): masked_forward (attention masks) is not implemented.


# -----------------------------------------------------------------------------
# Parameter preparation (PyTorch layout -> kernel-friendly layout)
# -----------------------------------------------------------------------------
def prepare_params(tp, num_heads):
    D = tp["self"]["Wout"].shape[0]
    hd = D // num_heads
    # half-split permutation: [even pair members, then odd pair members]
    perm = jnp.concatenate([jnp.arange(0, hd, 2), jnp.arange(1, hd, 2)]).astype(jnp.int32)

    def prep_ffn(f):
        Dm = f["W2"].shape[0]
        return dict(
            w1aT=jnp.transpose(f["W1"][:, :Dm]),
            w1bT=jnp.transpose(f["W1"][:, Dm:]),
            b1=f["b1"].reshape(1, -1),
            gamma=f["gamma"].reshape(1, -1),
            beta=f["beta"].reshape(1, -1),
            w2T=jnp.transpose(f["W2"]),
            b2=f["b2"].reshape(1, -1),
        )

    sp = tp["self"]
    # Wqkv torch layout: out index = h*hd*3 + d*3 + c (c in {q,k,v}).
    w = sp["Wqkv"].reshape(num_heads, hd, 3, D)
    w = jnp.transpose(w, (2, 0, 1, 3))                 # (3, H, hd, D)
    w = w.at[0].set(w[0][:, perm, :])                  # permute q rows to half-split
    w = w.at[1].set(w[1][:, perm, :])                  # permute k rows to half-split
    wqkvT = jnp.transpose(w.reshape(3 * D, D))         # (D, 3D): cols = [q | k | v]
    b = sp["bqkv"].reshape(num_heads, hd, 3)
    b = jnp.transpose(b, (2, 0, 1))                    # (3, H, hd)
    b = b.at[0].set(b[0][:, perm])
    b = b.at[1].set(b[1][:, perm])
    bqkv = b.reshape(1, 3 * D)

    cp = tp["cross"]
    return dict(
        self=dict(perm=perm, wqkvT=wqkvT, bqkv=bqkv,
                  woutT=jnp.transpose(sp["Wout"]), bout=sp["bout"].reshape(1, -1),
                  ffn=prep_ffn(sp["ffn"])),
        cross=dict(wqkT=jnp.transpose(cp["Wqk"]), bqk=cp["bqk"].reshape(1, -1),
                   wvT=jnp.transpose(cp["Wv"]), bv=cp["bv"].reshape(1, -1),
                   woutT=jnp.transpose(cp["Wout"]), bout=cp["bout"].reshape(1, -1),
                   ffn=prep_ffn(cp["ffn"])),
    )


# -----------------------------------------------------------------------------
# Pure-JAX reference (mirrors the PyTorch module op-by-op)
# -----------------------------------------------------------------------------
def _rotate_half_ref(x):
    shape = x.shape
    xr = x.reshape(shape[:-1] + (shape[-1] // 2, 2))
    x1, x2 = xr[..., 0], xr[..., 1]
    return jnp.stack((-x2, x1), axis=-1).reshape(shape)


def _apply_rotary_ref(freqs, t):
    return t * freqs[0] + _rotate_half_ref(t) * freqs[1]


def _linear_ref(x, w, b):
    return x @ w.T + b


def _ffn_ref(fp, h):
    h = _linear_ref(h, fp["W1"], fp["b1"])
    mu = jnp.mean(h, -1, keepdims=True)
    var = jnp.mean((h - mu) ** 2, -1, keepdims=True)
    h = (h - mu) / jnp.sqrt(var + 1e-5) * fp["gamma"] + fp["beta"]
    h = jax.nn.gelu(h, approximate=True)
    return _linear_ref(h, fp["W2"], fp["b2"])


def _self_block_ref(sp, x, enc, num_heads):
    B, N, D = x.shape
    hd = D // num_heads
    qkv = _linear_ref(x, sp["Wqkv"], sp["bqkv"]).reshape(B, N, num_heads, hd, 3)
    qkv = jnp.transpose(qkv, (0, 2, 1, 3, 4))
    q, k, v = qkv[..., 0], qkv[..., 1], qkv[..., 2]
    q = _apply_rotary_ref(enc, q)
    k = _apply_rotary_ref(enc, k)
    s = jnp.einsum("bhid,bhjd->bhij", q, k) * (hd ** -0.5)
    attn = jax.nn.softmax(s, axis=-1)
    ctx = jnp.einsum("bhij,bhjd->bhid", attn, v)
    ctx = jnp.transpose(ctx, (0, 2, 1, 3)).reshape(B, N, D)
    msg = _linear_ref(ctx, sp["Wout"], sp["bout"])
    return x + _ffn_ref(sp["ffn"], jnp.concatenate([x, msg], -1))


def _cross_block_ref(cp, x0, x1, num_heads):
    B, _, D = x0.shape
    hd = D // num_heads

    def heads(t):
        return jnp.transpose(t.reshape(B, -1, num_heads, hd), (0, 2, 1, 3))

    qk0 = heads(_linear_ref(x0, cp["Wqk"], cp["bqk"]))
    qk1 = heads(_linear_ref(x1, cp["Wqk"], cp["bqk"]))
    v0 = heads(_linear_ref(x0, cp["Wv"], cp["bv"]))
    v1 = heads(_linear_ref(x1, cp["Wv"], cp["bv"]))
    scale = hd ** -0.5
    qk0 = qk0 * scale ** 0.5
    qk1 = qk1 * scale ** 0.5
    sim = jnp.einsum("bhid,bhjd->bhij", qk0, qk1)
    attn01 = jax.nn.softmax(sim, axis=-1)
    attn10 = jax.nn.softmax(jnp.swapaxes(sim, -1, -2), axis=-1)
    m0 = jnp.einsum("bhij,bhjd->bhid", attn01, v1)
    m1 = jnp.einsum("bhij,bhjd->bhid", attn10, v0)

    def merge(t):
        return jnp.transpose(t, (0, 2, 1, 3)).reshape(B, -1, D)

    m0 = _linear_ref(merge(m0), cp["Wout"], cp["bout"])
    m1 = _linear_ref(merge(m1), cp["Wout"], cp["bout"])
    x0 = x0 + _ffn_ref(cp["ffn"], jnp.concatenate([x0, m0], -1))
    x1 = x1 + _ffn_ref(cp["ffn"], jnp.concatenate([x1, m1], -1))
    return x0, x1


def transformer_layer_ref(tp, desc0, desc1, enc0, enc1, num_heads):
    d0 = _self_block_ref(tp["self"], desc0, enc0, num_heads)
    d1 = _self_block_ref(tp["self"], desc1, enc1, num_heads)
    return _cross_block_ref(tp["cross"], d0, d1, num_heads)


# -----------------------------------------------------------------------------
# Test
# -----------------------------------------------------------------------------
if __name__ == "__main__":
    B, N, D, H = 2, 16, 64, 2
    hd = D // H

    key = jax.random.PRNGKey(0)
    keys = jax.random.split(key, 16)

    def make_linear(k, out_f, in_f):
        kw, kb = jax.random.split(k)
        bound = 1.0 / math.sqrt(in_f)
        w = jax.random.uniform(kw, (out_f, in_f), jnp.float32, -bound, bound)
        b = jax.random.uniform(kb, (out_f,), jnp.float32, -bound, bound)
        return w, b

    Wqkv, bqkv_t = make_linear(keys[0], 3 * D, D)
    Wout_s, bout_s = make_linear(keys[1], D, D)
    W1_s, b1_s = make_linear(keys[2], 2 * D, 2 * D)
    gamma_s = 1.0 + 0.1 * jax.random.normal(keys[3], (2 * D,), jnp.float32)
    beta_s = 0.1 * jax.random.normal(keys[4], (2 * D,), jnp.float32)
    W2_s, b2_s = make_linear(keys[5], D, 2 * D)

    Wqk_c, bqk_c = make_linear(keys[6], D, D)
    Wv_c, bv_c = make_linear(keys[7], D, D)
    Wo_c, bo_c = make_linear(keys[8], D, D)
    W1_c, b1_c = make_linear(keys[9], 2 * D, 2 * D)
    gamma_c = 1.0 + 0.1 * jax.random.normal(keys[10], (2 * D,), jnp.float32)
    beta_c = 0.1 * jax.random.normal(keys[11], (2 * D,), jnp.float32)
    W2_c, b2_c = make_linear(keys[12], D, 2 * D)

    desc0 = jax.random.normal(keys[13], (B, N, D), jnp.float32)
    desc1 = jax.random.normal(keys[14], (B, N, D), jnp.float32)

    def make_encoding(positions, head_dim, batch):
        half = head_dim // 2
        freqs = 1.0 / (10000.0 ** (jnp.arange(half, dtype=jnp.float32) / half))
        theta = positions[:, None] * freqs[None, :]          # (N, half)
        theta = jnp.repeat(theta, 2, axis=-1)                # (N, hd) interleaved pairs
        enc = jnp.stack([jnp.cos(theta), jnp.sin(theta)], axis=0)
        return jnp.broadcast_to(enc[:, None, None, :, :],
                                (2, batch, 1, positions.shape[0], head_dim))

    enc0 = make_encoding(jnp.arange(N, dtype=jnp.float32), hd, B)
    enc1 = make_encoding(jnp.arange(N, dtype=jnp.float32) * 1.5 + 0.25, hd, B)

    tparams = dict(
        self=dict(Wqkv=Wqkv, bqkv=bqkv_t, Wout=Wout_s, bout=bout_s,
                  ffn=dict(W1=W1_s, b1=b1_s, gamma=gamma_s, beta=beta_s,
                           W2=W2_s, b2=b2_s)),
        cross=dict(Wqk=Wqk_c, bqk=bqk_c, Wv=Wv_c, bv=bv_c, Wout=Wo_c, bout=bo_c,
                   ffn=dict(W1=W1_c, b1=b1_c, gamma=gamma_c, beta=beta_c,
                            W2=W2_c, b2=b2_c)),
    )
    kparams = prepare_params(tparams, H)

    out0, out1 = transformer_layer_forward(kparams, desc0, desc1, enc0, enc1,
                                           num_heads=H)
    jax.block_until_ready((out0, out1))

    ref0, ref1 = transformer_layer_ref(tparams, desc0, desc1, enc0, enc1, H)

    assert out0.shape == (B, N, D) and out1.shape == (B, N, D)
    assert jnp.allclose(out0, ref0, atol=1e-3, rtol=1e-3), (
        "desc0 mismatch, max err %e" % float(jnp.max(jnp.abs(out0 - ref0))))
    assert jnp.allclose(out1, ref1, atol=1e-3, rtol=1e-3), (
        "desc1 mismatch, max err %e" % float(jnp.max(jnp.abs(out1 - ref1))))

    print("KERNEL_OK")
</pallas_src>

<mosaic_0001>
module attributes {stable_mosaic.version = 11 : i64} {
  func.func @_self_attn_kernel(%arg0: i32, %arg1: memref<1x16x64xf32, #tpu.memory_space<vmem>>, %arg2: memref<1x16x32xf32, #tpu.memory_space<vmem>>, %arg3: memref<1x16x32xf32, #tpu.memory_space<vmem>>, %arg4: memref<64x192xf32, #tpu.memory_space<vmem>>, %arg5: memref<1x192xf32, #tpu.memory_space<vmem>>, %arg6: memref<64x64xf32, #tpu.memory_space<vmem>>, %arg7: memref<1x64xf32, #tpu.memory_space<vmem>>, %arg8: memref<1x16x64xf32, #tpu.memory_space<vmem>>) attributes {dimension_semantics = [#tpu.dimension_semantics<parallel>], iteration_bounds = array<i64: 4>, scalar_prefetch = 0 : i64, scratch_operands = 0 : i64, tpu.core_type = #tpu.core_type<tc>, window_params = [{transform_indices = @transform_0, window_bounds = array<i64: 1, 16, 64>}, {transform_indices = @transform_1, window_bounds = array<i64: 1, 16, 32>}, {transform_indices = @transform_2, window_bounds = array<i64: 1, 16, 32>}, {pipeline_mode = #tpu.pipeline_mode<synchronous>, transform_indices = @transform_3, window_bounds = array<i64: 64, 192>}, {pipeline_mode = #tpu.pipeline_mode<synchronous>, transform_indices = @transform_4, window_bounds = array<i64: 1, 192>}, {pipeline_mode = #tpu.pipeline_mode<synchronous>, transform_indices = @transform_5, window_bounds = array<i64: 64, 64>}, {pipeline_mode = #tpu.pipeline_mode<synchronous>, transform_indices = @transform_6, window_bounds = array<i64: 1, 64>}, {transform_indices = @transform_7, window_bounds = array<i64: 1, 16, 64>}]} {
    %c0 = arith.constant 0 : index
    %c0_0 = arith.constant 0 : index
    %c0_1 = arith.constant 0 : index
    %0 = vector.load %arg1[%c0, %c0_0, %c0_1] : memref<1x16x64xf32, #tpu.memory_space<vmem>>, vector<1x16x64xf32>
    %1 = vector.shape_cast %0 : vector<1x16x64xf32> to vector<16x64xf32>
    %c0_2 = arith.constant 0 : index
    %c0_3 = arith.constant 0 : index
    %c0_4 = arith.constant 0 : index
    %2 = vector.load %arg2[%c0_2, %c0_3, %c0_4] : memref<1x16x32xf32, #tpu.memory_space<vmem>>, vector<1x16x32xf32>
    %3 = vector.shape_cast %2 : vector<1x16x32xf32> to vector<16x32xf32>
    %c0_5 = arith.constant 0 : index
    %c0_6 = arith.constant 0 : index
    %c0_7 = arith.constant 0 : index
    %4 = vector.load %arg3[%c0_5, %c0_6, %c0_7] : memref<1x16x32xf32, #tpu.memory_space<vmem>>, vector<1x16x32xf32>
    %5 = vector.shape_cast %4 : vector<1x16x32xf32> to vector<16x32xf32>
    %c0_8 = arith.constant 0 : index
    %c0_9 = arith.constant 0 : index
    %6 = vector.load %arg4[%c0_8, %c0_9] : memref<64x192xf32, #tpu.memory_space<vmem>>, vector<64x192xf32>
    %cst = arith.constant dense<0.000000e+00> : vector<16x192xf32>
    %7 = tpu.matmul %1, %6, %cst {dimension_numbers = #tpu.dot_dimension_numbers<[1], [0], [0], [1], [0, 0, 1, 1], [], []>} : vector<16x64xf32>, vector<64x192xf32>, vector<16x192xf32> -> vector<16x192xf32>
    %c0_10 = arith.constant 0 : index
    %c0_11 = arith.constant 0 : index
    %8 = vector.load %arg5[%c0_10, %c0_11] : memref<1x192xf32, #tpu.memory_space<vmem>>, vector<1x192xf32>
    %9 = vector.broadcast %8 : vector<1x192xf32> to vector<16x192xf32>
    %10 = arith.addf %7, %9 : vector<16x192xf32>
    %11 = vector.extract_strided_slice %10 {offsets = [0, 0], sizes = [16, 32], strides = [1, 1]} : vector<16x192xf32> to vector<16x32xf32>
    %12 = vector.extract_strided_slice %10 {offsets = [0, 64], sizes = [16, 32], strides = [1, 1]} : vector<16x192xf32> to vector<16x32xf32>
    %13 = vector.extract_strided_slice %10 {offsets = [0, 128], sizes = [16, 32], strides = [1, 1]} : vector<16x192xf32> to vector<16x32xf32>
    %14 = arith.mulf %11, %3 : vector<16x32xf32>
    %15 = vector.extract_strided_slice %11 {offsets = [0, 16], sizes = [16, 16], strides = [1, 1]} : vector<16x32xf32> to vector<16x16xf32>
    %cst_12 = arith.constant 0.000000e+00 : f32
    %16 = vector.broadcast %cst_12 : f32 to vector<16x16xf32>
    %17 = arith.subf %16, %15 : vector<16x16xf32>
    %18 = vector.extract_strided_slice %11 {offsets = [0, 0], sizes = [16, 16], strides = [1, 1]} : vector<16x32xf32> to vector<16x16xf32>
    %19 = tpu.concatenate %17, %18 in 1 : vector<16x16xf32>, vector<16x16xf32> -> vector<16x32xf32>
    %20 = arith.mulf %19, %5 : vector<16x32xf32>
    %21 = arith.addf %14, %20 : vector<16x32xf32>
    %22 = arith.mulf %12, %3 : vector<16x32xf32>
    %23 = vector.extract_strided_slice %12 {offsets = [0, 16], sizes = [16, 16], strides = [1, 1]} : vector<16x32xf32> to vector<16x16xf32>
    %cst_13 = arith.constant 0.000000e+00 : f32
    %24 = vector.broadcast %cst_13 : f32 to vector<16x16xf32>
    %25 = arith.subf %24, %23 : vector<16x16xf32>
    %26 = vector.extract_strided_slice %12 {offsets = [0, 0], sizes = [16, 16], strides = [1, 1]} : vector<16x32xf32> to vector<16x16xf32>
    %27 = tpu.concatenate %25, %26 in 1 : vector<16x16xf32>, vector<16x16xf32> -> vector<16x32xf32>
    %28 = arith.mulf %27, %5 : vector<16x32xf32>
    %29 = arith.addf %22, %28 : vector<16x32xf32>
    %cst_14 = arith.constant dense<0.000000e+00> : vector<16x16xf32>
    %30 = tpu.matmul %21, %29, %cst_14 {dimension_numbers = #tpu.dot_dimension_numbers<[1], [1], [0], [0], [0, 0, 1, 0], [], []>} : vector<16x32xf32>, vector<16x32xf32>, vector<16x16xf32> -> vector<16x16xf32>
    %cst_15 = arith.constant 0.176776692 : f32
    %31 = vector.broadcast %cst_15 : f32 to vector<16x16xf32>
    %32 = arith.mulf %30, %31 : vector<16x16xf32>
    %cst_16 = arith.constant dense<0xFF800000> : vector<16xf32>
    %33 = vector.multi_reduction <maximumf>, %32, %cst_16 [1] : vector<16x16xf32> to vector<16xf32>
    %34 = vector.shape_cast %33 : vector<16xf32> to vector<16x1xf32>
    %35 = vector.broadcast %34 : vector<16x1xf32> to vector<16x16xf32>
    %36 = arith.subf %32, %35 : vector<16x16xf32>
    %37 = math.exp %36 : vector<16x16xf32>
    %cst_17 = arith.constant dense<0.000000e+00> : vector<16xf32>
    %38 = vector.multi_reduction <add>, %37, %cst_17 [1] : vector<16x16xf32> to vector<16xf32>
    %39 = vector.shape_cast %38 : vector<16xf32> to vector<16x1xf32>
    %40 = vector.broadcast %39 : vector<16x1xf32> to vector<16x16xf32>
    %41 = arith.divf %37, %40 : vector<16x16xf32>
    %cst_18 = arith.constant dense<0.000000e+00> : vector<16x32xf32>
    %42 = tpu.matmul %41, %13, %cst_18 {dimension_numbers = #tpu.dot_dimension_numbers<[1], [0], [0], [1], [0, 0, 1, 1], [], []>} : vector<16x16xf32>, vector<16x32xf32>, vector<16x32xf32> -> vector<16x32xf32>
    %43 = vector.extract_strided_slice %10 {offsets = [0, 32], sizes = [16, 32], strides = [1, 1]} : vector<16x192xf32> to vector<16x32xf32>
    %44 = vector.extract_strided_slice %10 {offsets = [0, 96], sizes = [16, 32], strides = [1, 1]} : vector<16x192xf32> to vector<16x32xf32>
    %45 = vector.extract_strided_slice %10 {offsets = [0, 160], sizes = [16, 32], strides = [1, 1]} : vector<16x192xf32> to vector<16x32xf32>
    %46 = arith.mulf %43, %3 : vector<16x32xf32>
    %47 = vector.extract_strided_slice %43 {offsets = [0, 16], sizes = [16, 16], strides = [1, 1]} : vector<16x32xf32> to vector<16x16xf32>
    %cst_19 = arith.constant 0.000000e+00 : f32
    %48 = vector.broadcast %cst_19 : f32 to vector<16x16xf32>
    %49 = arith.subf %48, %47 : vector<16x16xf32>
    %50 = vector.extract_strided_slice %43 {offsets = [0, 0], sizes = [16, 16], strides = [1, 1]} : vector<16x32xf32> to vector<16x16xf32>
    %51 = tpu.concatenate %49, %50 in 1 : vector<16x16xf32>, vector<16x16xf32> -> vector<16x32xf32>
    %52 = arith.mulf %51, %5 : vector<16x32xf32>
    %53 = arith.addf %46, %52 : vector<16x32xf32>
    %54 = arith.mulf %44, %3 : vector<16x32xf32>
    %55 = vector.extract_strided_slice %44 {offsets = [0, 16], sizes = [16, 16], strides = [1, 1]} : vector<16x32xf32> to vector<16x16xf32>
    %cst_20 = arith.constant 0.000000e+00 : f32
    %56 = vector.broadcast %cst_20 : f32 to vector<16x16xf32>
    %57 = arith.subf %56, %55 : vector<16x16xf32>
    %58 = vector.extract_strided_slice %44 {offsets = [0, 0], sizes = [16, 16], strides = [1, 1]} : vector<16x32xf32> to vector<16x16xf32>
    %59 = tpu.concatenate %57, %58 in 1 : vector<16x16xf32>, vector<16x16xf32> -> vector<16x32xf32>
    %60 = arith.mulf %59, %5 : vector<16x32xf32>
    %61 = arith.addf %54, %60 : vector<16x32xf32>
    %cst_21 = arith.constant dense<0.000000e+00> : vector<16x16xf32>
    %62 = tpu.matmul %53, %61, %cst_21 {dimension_numbers = #tpu.dot_dimension_numbers<[1], [1], [0], [0], [0, 0, 1, 0], [], []>} : vector<16x32xf32>, vector<16x32xf32>, vector<16x16xf32> -> vector<16x16xf32>
    %cst_22 = arith.constant 0.176776692 : f32
    %63 = vector.broadcast %cst_22 : f32 to vector<16x16xf32>
    %64 = arith.mulf %62, %63 : vector<16x16xf32>
    %cst_23 = arith.constant dense<0xFF800000> : vector<16xf32>
    %65 = vector.multi_reduction <maximumf>, %64, %cst_23 [1] : vector<16x16xf32> to vector<16xf32>
    %66 = vector.shape_cast %65 : vector<16xf32> to vector<16x1xf32>
    %67 = vector.broadcast %66 : vector<16x1xf32> to vector<16x16xf32>
    %68 = arith.subf %64, %67 : vector<16x16xf32>
    %69 = math.exp %68 : vector<16x16xf32>
    %cst_24 = arith.constant dense<0.000000e+00> : vector<16xf32>
    %70 = vector.multi_reduction <add>, %69, %cst_24 [1] : vector<16x16xf32> to vector<16xf32>
    %71 = vector.shape_cast %70 : vector<16xf32> to vector<16x1xf32>
    %72 = vector.broadcast %71 : vector<16x1xf32> to vector<16x16xf32>
    %73 = arith.divf %69, %72 : vector<16x16xf32>
    %cst_25 = arith.constant dense<0.000000e+00> : vector<16x32xf32>
    %74 = tpu.matmul %73, %45, %cst_25 {dimension_numbers = #tpu.dot_dimension_numbers<[1], [0], [0], [1], [0, 0, 1, 1], [], []>} : vector<16x16xf32>, vector<16x32xf32>, vector<16x32xf32> -> vector<16x32xf32>
    %75 = tpu.concatenate %42, %74 in 1 : vector<16x32xf32>, vector<16x32xf32> -> vector<16x64xf32>
    %c0_26 = arith.constant 0 : index
    %c0_27 = arith.constant 0 : index
    %76 = vector.load %arg6[%c0_26, %c0_27] : memref<64x64xf32, #tpu.memory_space<vmem>>, vector<64x64xf32>
    %cst_28 = arith.constant dense<0.000000e+00> : vector<16x64xf32>
    %77 = tpu.matmul %75, %76, %cst_28 {dimension_numbers = #tpu.dot_dimension_numbers<[1], [0], [0], [1], [0, 0, 1, 1], [], []>} : vector<16x64xf32>, vector<64x64xf32>, vector<16x64xf32> -> vector<16x64xf32>
    %c0_29 = arith.constant 0 : index
    %c0_30 = arith.constant 0 : index
    %78 = vector.load %arg7[%c0_29, %c0_30] : memref<1x64xf32, #tpu.memory_space<vmem>>, vector<1x64xf32>
    %79 = vector.broadcast %78 : vector<1x64xf32> to vector<16x64xf32>
    %80 = arith.addf %77, %79 : vector<16x64xf32>
    %c0_31 = arith.constant 0 : index
    %c0_32 = arith.constant 0 : index
    %c0_33 = arith.constant 0 : index
    %81 = vector.load %arg8[%c0_31, %c0_32, %c0_33] : memref<1x16x64xf32, #tpu.memory_space<vmem>>, vector<1x16x64xf32>
    %82 = vector.shape_cast %81 : vector<1x16x64xf32> to vector<16x64xf32>
    %83 = vector.shape_cast %80 : vector<16x64xf32> to vector<1x16x64xf32>
    tpu.vector_store %arg8[%c0_31, %c0_32, %c0_33], %83 {strides = array<i32>} : memref<1x16x64xf32, #tpu.memory_space<vmem>>, vector<1x16x64xf32>,
    return
  }
  func.func @transform_0(%arg0: i32) -> (i32, i32, i32) {
    %c0_i32 = arith.constant 0 : i32
    %c0_i32_0 = arith.constant 0 : i32
    %c0_i32_1 = arith.constant 0 : i32
    return %arg0, %c0_i32, %c0_i32_0 : i32, i32, i32
  }
  func.func @transform_1(%arg0: i32) -> (i32, i32, i32) {
    %c0_i32 = arith.constant 0 : i32
    %c0_i32_0 = arith.constant 0 : i32
    %c0_i32_1 = arith.constant 0 : i32
    return %arg0, %c0_i32, %c0_i32_0 : i32, i32, i32
  }
  func.func @transform_2(%arg0: i32) -> (i32, i32, i32) {
    %c0_i32 = arith.constant 0 : i32
    %c0_i32_0 = arith.constant 0 : i32
    %c0_i32_1 = arith.constant 0 : i32
    return %arg0, %c0_i32, %c0_i32_0 : i32, i32, i32
  }
  func.func @transform_3(%arg0: i32) -> (i32, i32) {
    %c0_i32 = arith.constant 0 : i32
    %c0_i32_0 = arith.constant 0 : i32
    %c0_i32_1 = arith.constant 0 : i32
    return %c0_i32, %c0_i32_0 : i32, i32
  }
  func.func @transform_4(%arg0: i32) -> (i32, i32) {
    %c0_i32 = arith.constant 0 : i32
    %c0_i32_0 = arith.constant 0 : i32
    %c0_i32_1 = arith.constant 0 : i32
    return %c0_i32, %c0_i32_0 : i32, i32
  }
  func.func @transform_5(%arg0: i32) -> (i32, i32) {
    %c0_i32 = arith.constant 0 : i32
    %c0_i32_0 = arith.constant 0 : i32
    %c0_i32_1 = arith.constant 0 : i32
    return %c0_i32, %c0_i32_0 : i32, i32
  }
  func.func @transform_6(%arg0: i32) -> (i32, i32) {
    %c0_i32 = arith.constant 0 : i32
    %c0_i32_0 = arith.constant 0 : i32
    %c0_i32_1 = arith.constant 0 : i32
    return %c0_i32, %c0_i32_0 : i32, i32
  }
  func.func @transform_7(%arg0: i32) -> (i32, i32, i32) {
    %c0_i32 = arith.constant 0 : i32
    %c0_i32_0 = arith.constant 0 : i32
    %c0_i32_1 = arith.constant 0 : i32
    return %arg0, %c0_i32, %c0_i32_0 : i32, i32, i32
  }
}

module attributes {stable_mosaic.version = 11 : i64} {
  func.func @_ffn_residual_kernel(%arg0: i32, %arg1: memref<64x64xf32, #tpu.memory_space<vmem>>, %arg2: memref<64x64xf32, #tpu.memory_space<vmem>>, %arg3: memref<64x128xf32, #tpu.memory_space<vmem>>, %arg4: memref<64x128xf32, #tpu.memory_space<vmem>>, %arg5: memref<1x128xf32, #tpu.memory_space<vmem>>, %arg6: memref<1x128xf32, #tpu.memory_space<vmem>>, %arg7: memref<1x128xf32, #tpu.memory_space<vmem>>, %arg8: memref<128x64xf32, #tpu.memory_space<vmem>>, %arg9: memref<1x64xf32, #tpu.memory_space<vmem>>, %arg10: memref<64x64xf32, #tpu.memory_space<vmem>>) attributes {dimension_semantics = [#tpu.dimension_semantics<parallel>], iteration_bounds = array<i64: 1>, scalar_prefetch = 0 : i64, scratch_operands = 0 : i64, tpu.core_type = #tpu.core_type<tc>, window_params = [{transform_indices = @transform_0, window_bounds = array<i64: 64, 64>}, {transform_indices = @transform_1, window_bounds = array<i64: 64, 64>}, {pipeline_mode = #tpu.pipeline_mode<synchronous>, transform_indices = @transform_2, window_bounds = array<i64: 64, 128>}, {pipeline_mode = #tpu.pipeline_mode<synchronous>, transform_indices = @transform_3, window_bounds = array<i64: 64, 128>}, {pipeline_mode = #tpu.pipeline_mode<synchronous>, transform_indices = @transform_4, window_bounds = array<i64: 1, 128>}, {pipeline_mode = #tpu.pipeline_mode<synchronous>, transform_indices = @transform_5, window_bounds = array<i64: 1, 128>}, {pipeline_mode = #tpu.pipeline_mode<synchronous>, transform_indices = @transform_6, window_bounds = array<i64: 1, 128>}, {pipeline_mode = #tpu.pipeline_mode<synchronous>, transform_indices = @transform_7, window_bounds = array<i64: 128, 64>}, {pipeline_mode = #tpu.pipeline_mode<synchronous>, transform_indices = @transform_8, window_bounds = array<i64: 1, 64>}, {transform_indices = @transform_9, window_bounds = array<i64: 64, 64>}]} {
    %c0 = arith.constant 0 : index
    %c0_0 = arith.constant 0 : index
    %0 = vector.load %arg1[%c0, %c0_0] : memref<64x64xf32, #tpu.memory_space<vmem>>, vector<64x64xf32>
    %c0_1 = arith.constant 0 : index
    %c0_2 = arith.constant 0 : index
    %1 = vector.load %arg2[%c0_1, %c0_2] : memref<64x64xf32, #tpu.memory_space<vmem>>, vector<64x64xf32>
    %c0_3 = arith.constant 0 : index
    %c0_4 = arith.constant 0 : index
    %2 = vector.load %arg3[%c0_3, %c0_4] : memref<64x128xf32, #tpu.memory_space<vmem>>, vector<64x128xf32>
    %cst = arith.constant dense<0.000000e+00> : vector<64x128xf32>
    %3 = tpu.matmul %0, %2, %cst {dimension_numbers = #tpu.dot_dimension_numbers<[1], [0], [0], [1], [0, 0, 1, 1], [], []>} : vector<64x64xf32>, vector<64x128xf32>, vector<64x128xf32> -> vector<64x128xf32>
    %c0_5 = arith.constant 0 : index
    %c0_6 = arith.constant 0 : index
    %4 = vector.load %arg4[%c0_5, %c0_6] : memref<64x128xf32, #tpu.memory_space<vmem>>, vector<64x128xf32>
    %cst_7 = arith.constant dense<0.000000e+00> : vector<64x128xf32>
    %5 = tpu.matmul %1, %4, %cst_7 {dimension_numbers = #tpu.dot_dimension_numbers<[1], [0], [0], [1], [0, 0, 1, 1], [], []>} : vector<64x64xf32>, vector<64x128xf32>, vector<64x128xf32> -> vector<64x128xf32>
    %6 = arith.addf %3, %5 : vector<64x128xf32>
    %c0_8 = arith.constant 0 : index
    %c0_9 = arith.constant 0 : index
    %7 = vector.load %arg5[%c0_8, %c0_9] : memref<1x128xf32, #tpu.memory_space<vmem>>, vector<1x128xf32>
    %8 = vector.broadcast %7 : vector<1x128xf32> to vector<64x128xf32>
    %9 = arith.addf %6, %8 : vector<64x128xf32>
    %cst_10 = arith.constant dense<0.000000e+00> : vector<64xf32>
    %10 = vector.multi_reduction <add>, %9, %cst_10 [1] : vector<64x128xf32> to vector<64xf32>
    %11 = vector.shape_cast %10 : vector<64xf32> to vector<64x1xf32>
    %cst_11 = arith.constant 1.280000e+02 : f32
    %12 = vector.broadcast %cst_11 : f32 to vector<64x1xf32>
    %13 = arith.divf %11, %12 : vector<64x1xf32>
    %14 = vector.broadcast %13 : vector<64x1xf32> to vector<64x128xf32>
    %15 = arith.subf %9, %14 : vector<64x128xf32>
    %16 = vector.broadcast %13 : vector<64x1xf32> to vector<64x128xf32>
    %17 = arith.subf %9, %16 : vector<64x128xf32>
    %18 = arith.mulf %15, %17 : vector<64x128xf32>
    %cst_12 = arith.constant dense<0.000000e+00> : vector<64xf32>
    %19 = vector.multi_reduction <add>, %18, %cst_12 [1] : vector<64x128xf32> to vector<64xf32>
    %20 = vector.shape_cast %19 : vector<64xf32> to vector<64x1xf32>
    %cst_13 = arith.constant 1.280000e+02 : f32
    %21 = vector.broadcast %cst_13 : f32 to vector<64x1xf32>
    %22 = arith.divf %20, %21 : vector<64x1xf32>
    %23 = vector.broadcast %13 : vector<64x1xf32> to vector<64x128xf32>
    %24 = arith.subf %9, %23 : vector<64x128xf32>
    %cst_14 = arith.constant 9.99999974E-6 : f32
    %25 = vector.broadcast %cst_14 : f32 to vector<64x1xf32>
    %26 = arith.addf %22, %25 : vector<64x1xf32>
    %27 = math.rsqrt %26 : vector<64x1xf32>
    %28 = vector.broadcast %27 : vector<64x1xf32> to vector<64x128xf32>
    %29 = arith.mulf %24, %28 : vector<64x128xf32>
    %c0_15 = arith.constant 0 : index
    %c0_16 = arith.constant 0 : index
    %30 = vector.load %arg6[%c0_15, %c0_16] : memref<1x128xf32, #tpu.memory_space<vmem>>, vector<1x128xf32>
    %31 = vector.broadcast %30 : vector<1x128xf32> to vector<64x128xf32>
    %32 = arith.mulf %29, %31 : vector<64x128xf32>
    %c0_17 = arith.constant 0 : index
    %c0_18 = arith.constant 0 : index
    %33 = vector.load %arg7[%c0_17, %c0_18] : memref<1x128xf32, #tpu.memory_space<vmem>>, vector<1x128xf32>
    %34 = vector.broadcast %33 : vector<1x128xf32> to vector<64x128xf32>
    %35 = arith.addf %32, %34 : vector<64x128xf32>
    %cst_19 = arith.constant 5.000000e-01 : f32
    %36 = vector.broadcast %cst_19 : f32 to vector<64x128xf32>
    %37 = arith.mulf %36, %35 : vector<64x128xf32>
    %cst_20 = arith.constant 4.471500e-02 : f32
    %38 = vector.broadcast %cst_20 : f32 to vector<64x128xf32>
    %39 = arith.mulf %38, %35 : vector<64x128xf32>
    %40 = arith.mulf %39, %35 : vector<64x128xf32>
    %41 = arith.mulf %40, %35 : vector<64x128xf32>
    %42 = arith.addf %35, %41 : vector<64x128xf32>
    %cst_21 = arith.constant 0.797884583 : f32
    %43 = vector.broadcast %cst_21 : f32 to vector<64x128xf32>
    %44 = arith.mulf %43, %42 : vector<64x128xf32>
    %45 = math.tanh %44 : vector<64x128xf32>
    %cst_22 = arith.constant 1.000000e+00 : f32
    %46 = vector.broadcast %cst_22 : f32 to vector<64x128xf32>
    %47 = arith.addf %46, %45 : vector<64x128xf32>
    %48 = arith.mulf %37, %47 : vector<64x128xf32>
    %c0_23 = arith.constant 0 : index
    %c0_24 = arith.constant 0 : index
    %49 = vector.load %arg8[%c0_23, %c0_24] : memref<128x64xf32, #tpu.memory_space<vmem>>, vector<128x64xf32>
    %cst_25 = arith.constant dense<0.000000e+00> : vector<64x64xf32>
    %50 = tpu.matmul %48, %49, %cst_25 {dimension_numbers = #tpu.dot_dimension_numbers<[1], [0], [0], [1], [0, 0, 1, 1], [], []>} : vector<64x128xf32>, vector<128x64xf32>, vector<64x64xf32> -> vector<64x64xf32>
    %c0_26 = arith.constant 0 : index
    %c0_27 = arith.constant 0 : index
    %51 = vector.load %arg9[%c0_26, %c0_27] : memref<1x64xf32, #tpu.memory_space<vmem>>, vector<1x64xf32>
    %52 = vector.broadcast %51 : vector<1x64xf32> to vector<64x64xf32>
    %53 = arith.addf %50, %52 : vector<64x64xf32>
    %54 = arith.addf %0, %53 : vector<64x64xf32>
    %c0_28 = arith.constant 0 : index
    %c0_29 = arith.constant 0 : index
    %55 = vector.load %arg10[%c0_28, %c0_29] : memref<64x64xf32, #tpu.memory_space<vmem>>, vector<64x64xf32>
    tpu.vector_store %arg10[%c0_28, %c0_29], %54 {strides = array<i32>} : memref<64x64xf32, #tpu.memory_space<vmem>>, vector<64x64xf32>,
    return
  }
  func.func @transform_0(%arg0: i32) -> (i32, i32) {
    %c0_i32 = arith.constant 0 : i32
    %c0_i32_0 = arith.constant 0 : i32
    return %arg0, %c0_i32 : i32, i32
  }
  func.func @transform_1(%arg0: i32) -> (i32, i32) {
    %c0_i32 = arith.constant 0 : i32
    %c0_i32_0 = arith.constant 0 : i32
    return %arg0, %c0_i32 : i32, i32
  }
  func.func @transform_2(%arg0: i32) -> (i32, i32) {
    %c0_i32 = arith.constant 0 : i32
    %c0_i32_0 = arith.constant 0 : i32
    %c0_i32_1 = arith.constant 0 : i32
    return %c0_i32, %c0_i32_0 : i32, i32
  }
  func.func @transform_3(%arg0: i32) -> (i32, i32) {
    %c0_i32 = arith.constant 0 : i32
    %c0_i32_0 = arith.constant 0 : i32
    %c0_i32_1 = arith.constant 0 : i32
    return %c0_i32, %c0_i32_0 : i32, i32
  }
  func.func @transform_4(%arg0: i32) -> (i32, i32) {
    %c0_i32 = arith.constant 0 : i32
    %c0_i32_0 = arith.constant 0 : i32
    %c0_i32_1 = arith.constant 0 : i32
    return %c0_i32, %c0_i32_0 : i32, i32
  }
  func.func @transform_5(%arg0: i32) -> (i32, i32) {
    %c0_i32 = arith.constant 0 : i32
    %c0_i32_0 = arith.constant 0 : i32
    %c0_i32_1 = arith.constant 0 : i32
    return %c0_i32, %c0_i32_0 : i32, i32
  }
  func.func @transform_6(%arg0: i32) -> (i32, i32) {
    %c0_i32 = arith.constant 0 : i32
    %c0_i32_0 = arith.constant 0 : i32
    %c0_i32_1 = arith.constant 0 : i32
    return %c0_i32, %c0_i32_0 : i32, i32
  }
  func.func @transform_7(%arg0: i32) -> (i32, i32) {
    %c0_i32 = arith.constant 0 : i32
    %c0_i32_0 = arith.constant 0 : i32
    %c0_i32_1 = arith.constant 0 : i32
    return %c0_i32, %c0_i32_0 : i32, i32
  }
  func.func @transform_8(%arg0: i32) -> (i32, i32) {
    %c0_i32 = arith.constant 0 : i32
    %c0_i32_0 = arith.constant 0 : i32
    %c0_i32_1 = arith.constant 0 : i32
    return %c0_i32, %c0_i32_0 : i32, i32
  }
  func.func @transform_9(%arg0: i32) -> (i32, i32) {
    %c0_i32 = arith.constant 0 : i32
    %c0_i32_0 = arith.constant 0 : i32
    return %arg0, %c0_i32 : i32, i32
  }
}

module attributes {stable_mosaic.version = 11 : i64} {
  func.func @_cross_attn_kernel(%arg0: i32, %arg1: memref<1x16x64xf32, #tpu.memory_space<vmem>>, %arg2: memref<1x16x64xf32, #tpu.memory_space<vmem>>, %arg3: memref<64x64xf32, #tpu.memory_space<vmem>>, %arg4: memref<1x64xf32, #tpu.memory_space<vmem>>, %arg5: memref<64x64xf32, #tpu.memory_space<vmem>>, %arg6: memref<1x64xf32, #tpu.memory_space<vmem>>, %arg7: memref<64x64xf32, #tpu.memory_space<vmem>>, %arg8: memref<1x64xf32, #tpu.memory_space<vmem>>, %arg9: memref<1x16x64xf32, #tpu.memory_space<vmem>>, %arg10: memref<1x16x64xf32, #tpu.memory_space<vmem>>) attributes {dimension_semantics = [#tpu.dimension_semantics<parallel>], iteration_bounds = array<i64: 2>, scalar_prefetch = 0 : i64, scratch_operands = 0 : i64, tpu.core_type = #tpu.core_type<tc>, window_params = [{transform_indices = @transform_0, window_bounds = array<i64: 1, 16, 64>}, {transform_indices = @transform_1, window_bounds = array<i64: 1, 16, 64>}, {pipeline_mode = #tpu.pipeline_mode<synchronous>, transform_indices = @transform_2, window_bounds = array<i64: 64, 64>}, {pipeline_mode = #tpu.pipeline_mode<synchronous>, transform_indices = @transform_3, window_bounds = array<i64: 1, 64>}, {pipeline_mode = #tpu.pipeline_mode<synchronous>, transform_indices = @transform_4, window_bounds = array<i64: 64, 64>}, {pipeline_mode = #tpu.pipeline_mode<synchronous>, transform_indices = @transform_5, window_bounds = array<i64: 1, 64>}, {pipeline_mode = #tpu.pipeline_mode<synchronous>, transform_indices = @transform_6, window_bounds = array<i64: 64, 64>}, {pipeline_mode = #tpu.pipeline_mode<synchronous>, transform_indices = @transform_7, window_bounds = array<i64: 1, 64>}, {transform_indices = @transform_8, window_bounds = array<i64: 1, 16, 64>}, {transform_indices = @transform_9, window_bounds = array<i64: 1, 16, 64>}]} {
    %c0 = arith.constant 0 : index
    %c0_0 = arith.constant 0 : index
    %c0_1 = arith.constant 0 : index
    %0 = vector.load %arg1[%c0, %c0_0, %c0_1] : memref<1x16x64xf32, #tpu.memory_space<vmem>>, vector<1x16x64xf32>
    %1 = vector.shape_cast %0 : vector<1x16x64xf32> to vector<16x64xf32>
    %c0_2 = arith.constant 0 : index
    %c0_3 = arith.constant 0 : index
    %c0_4 = arith.constant 0 : index
    %2 = vector.load %arg2[%c0_2, %c0_3, %c0_4] : memref<1x16x64xf32, #tpu.memory_space<vmem>>, vector<1x16x64xf32>
    %3 = vector.shape_cast %2 : vector<1x16x64xf32> to vector<16x64xf32>
    %c0_5 = arith.constant 0 : index
    %c0_6 = arith.constant 0 : index
    %4 = vector.load %arg3[%c0_5, %c0_6] : memref<64x64xf32, #tpu.memory_space<vmem>>, vector<64x64xf32>
    %c0_7 = arith.constant 0 : index
    %c0_8 = arith.constant 0 : index
    %5 = vector.load %arg4[%c0_7, %c0_8] : memref<1x64xf32, #tpu.memory_space<vmem>>, vector<1x64xf32>
    %c0_9 = arith.constant 0 : index
    %c0_10 = arith.constant 0 : index
    %6 = vector.load %arg5[%c0_9, %c0_10] : memref<64x64xf32, #tpu.memory_space<vmem>>, vector<64x64xf32>
    %c0_11 = arith.constant 0 : index
    %c0_12 = arith.constant 0 : index
    %7 = vector.load %arg6[%c0_11, %c0_12] : memref<1x64xf32, #tpu.memory_space<vmem>>, vector<1x64xf32>
    %cst = arith.constant dense<0.000000e+00> : vector<16x64xf32>
    %8 = tpu.matmul %1, %4, %cst {dimension_numbers = #tpu.dot_dimension_numbers<[1], [0], [0], [1], [0, 0, 1, 1], [], []>} : vector<16x64xf32>, vector<64x64xf32>, vector<16x64xf32> -> vector<16x64xf32>
    %9 = vector.broadcast %5 : vector<1x64xf32> to vector<16x64xf32>
    %10 = arith.addf %8, %9 : vector<16x64xf32>
    %cst_13 = arith.constant dense<0.000000e+00> : vector<16x64xf32>
    %11 = tpu.matmul %3, %4, %cst_13 {dimension_numbers = #tpu.dot_dimension_numbers<[1], [0], [0], [1], [0, 0, 1, 1], [], []>} : vector<16x64xf32>, vector<64x64xf32>, vector<16x64xf32> -> vector<16x64xf32>
    %12 = vector.broadcast %5 : vector<1x64xf32> to vector<16x64xf32>
    %13 = arith.addf %11, %12 : vector<16x64xf32>
    %cst_14 = arith.constant dense<0.000000e+00> : vector<16x64xf32>
    %14 = tpu.matmul %1, %6, %cst_14 {dimension_numbers = #tpu.dot_dimension_numbers<[1], [0], [0], [1], [0, 0, 1, 1], [], []>} : vector<16x64xf32>, vector<64x64xf32>, vector<16x64xf32> -> vector<16x64xf32>
    %15 = vector.broadcast %7 : vector<1x64xf32> to vector<16x64xf32>
    %16 = arith.addf %14, %15 : vector<16x64xf32>
    %cst_15 = arith.constant dense<0.000000e+00> : vector<16x64xf32>
    %17 = tpu.matmul %3, %6, %cst_15 {dimension_numbers = #tpu.dot_dimension_numbers<[1], [0], [0], [1], [0, 0, 1, 1], [], []>} : vector<16x64xf32>, vector<64x64xf32>, vector<16x64xf32> -> vector<16x64xf32>
    %18 = vector.broadcast %7 : vector<1x64xf32> to vector<16x64xf32>
    %19 = arith.addf %17, %18 : vector<16x64xf32>
    %20 = vector.extract_strided_slice %10 {offsets = [0, 0], sizes = [16, 32], strides = [1, 1]} : vector<16x64xf32> to vector<16x32xf32>
    %cst_16 = arith.constant 0.420448214 : f32
    %21 = vector.broadcast %cst_16 : f32 to vector<16x32xf32>
    %22 = arith.mulf %20, %21 : vector<16x32xf32>
    %23 = vector.extract_strided_slice %13 {offsets = [0, 0], sizes = [16, 32], strides = [1, 1]} : vector<16x64xf32> to vector<16x32xf32>
    %cst_17 = arith.constant 0.420448214 : f32
    %24 = vector.broadcast %cst_17 : f32 to vector<16x32xf32>
    %25 = arith.mulf %23, %24 : vector<16x32xf32>
    %cst_18 = arith.constant dense<0.000000e+00> : vector<16x16xf32>
    %26 = tpu.matmul %22, %25, %cst_18 {dimension_numbers = #tpu.dot_dimension_numbers<[1], [1], [0], [0], [0, 0, 1, 0], [], []>} : vector<16x32xf32>, vector<16x32xf32>, vector<16x16xf32> -> vector<16x16xf32>
    %cst_19 = arith.constant dense<0.000000e+00> : vector<16x16xf32>
    %27 = tpu.matmul %25, %22, %cst_19 {dimension_numbers = #tpu.dot_dimension_numbers<[1], [1], [0], [0], [0, 0, 1, 0], [], []>} : vector<16x32xf32>, vector<16x32xf32>, vector<16x16xf32> -> vector<16x16xf32>
    %cst_20 = arith.constant dense<0xFF800000> : vector<16xf32>
    %28 = vector.multi_reduction <maximumf>, %26, %cst_20 [1] : vector<16x16xf32> to vector<16xf32>
    %29 = vector.shape_cast %28 : vector<16xf32> to vector<16x1xf32>
    %30 = vector.broadcast %29 : vector<16x1xf32> to vector<16x16xf32>
    %31 = arith.subf %26, %30 : vector<16x16xf32>
    %32 = math.exp %31 : vector<16x16xf32>
    %cst_21 = arith.constant dense<0.000000e+00> : vector<16xf32>
    %33 = vector.multi_reduction <add>, %32, %cst_21 [1] : vector<16x16xf32> to vector<16xf32>
    %34 = vector.shape_cast %33 : vector<16xf32> to vector<16x1xf32>
    %35 = vector.broadcast %34 : vector<16x1xf32> to vector<16x16xf32>
    %36 = arith.divf %32, %35 : vector<16x16xf32>
    %cst_22 = arith.constant dense<0xFF800000> : vector<16xf32>
    %37 = vector.multi_reduction <maximumf>, %27, %cst_22 [1] : vector<16x16xf32> to vector<16xf32>
    %38 = vector.shape_cast %37 : vector<16xf32> to vector<16x1xf32>
    %39 = vector.broadcast %38 : vector<16x1xf32> to vector<16x16xf32>
    %40 = arith.subf %27, %39 : vector<16x16xf32>
    %41 = math.exp %40 : vector<16x16xf32>
    %cst_23 = arith.constant dense<0.000000e+00> : vector<16xf32>
    %42 = vector.multi_reduction <add>, %41, %cst_23 [1] : vector<16x16xf32> to vector<16xf32>
    %43 = vector.shape_cast %42 : vector<16xf32> to vector<16x1xf32>
    %44 = vector.broadcast %43 : vector<16x1xf32> to vector<16x16xf32>
    %45 = arith.divf %41, %44 : vector<16x16xf32>
    %46 = vector.extract_strided_slice %19 {offsets = [0, 0], sizes = [16, 32], strides = [1, 1]} : vector<16x64xf32> to vector<16x32xf32>
    %cst_24 = arith.constant dense<0.000000e+00> : vector<16x32xf32>
    %47 = tpu.matmul %36, %46, %cst_24 {dimension_numbers = #tpu.dot_dimension_numbers<[1], [0], [0], [1], [0, 0, 1, 1], [], []>} : vector<16x16xf32>, vector<16x32xf32>, vector<16x32xf32> -> vector<16x32xf32>
    %48 = vector.extract_strided_slice %16 {offsets = [0, 0], sizes = [16, 32], strides = [1, 1]} : vector<16x64xf32> to vector<16x32xf32>
    %cst_25 = arith.constant dense<0.000000e+00> : vector<16x32xf32>
    %49 = tpu.matmul %45, %48, %cst_25 {dimension_numbers = #tpu.dot_dimension_numbers<[1], [0], [0], [1], [0, 0, 1, 1], [], []>} : vector<16x16xf32>, vector<16x32xf32>, vector<16x32xf32> -> vector<16x32xf32>
    %50 = vector.extract_strided_slice %10 {offsets = [0, 32], sizes = [16, 32], strides = [1, 1]} : vector<16x64xf32> to vector<16x32xf32>
    %cst_26 = arith.constant 0.420448214 : f32
    %51 = vector.broadcast %cst_26 : f32 to vector<16x32xf32>
    %52 = arith.mulf %50, %51 : vector<16x32xf32>
    %53 = vector.extract_strided_slice %13 {offsets = [0, 32], sizes = [16, 32], strides = [1, 1]} : vector<16x64xf32> to vector<16x32xf32>
    %cst_27 = arith.constant 0.420448214 : f32
    %54 = vector.broadcast %cst_27 : f32 to vector<16x32xf32>
    %55 = arith.mulf %53, %54 : vector<16x32xf32>
    %cst_28 = arith.constant dense<0.000000e+00> : vector<16x16xf32>
    %56 = tpu.matmul %52, %55, %cst_28 {dimension_numbers = #tpu.dot_dimension_numbers<[1], [1], [0], [0], [0, 0, 1, 0], [], []>} : vector<16x32xf32>, vector<16x32xf32>, vector<16x16xf32> -> vector<16x16xf32>
    %cst_29 = arith.constant dense<0.000000e+00> : vector<16x16xf32>
    %57 = tpu.matmul %55, %52, %cst_29 {dimension_numbers = #tpu.dot_dimension_numbers<[1], [1], [0], [0], [0, 0, 1, 0], [], []>} : vector<16x32xf32>, vector<16x32xf32>, vector<16x16xf32> -> vector<16x16xf32>
    %cst_30 = arith.constant dense<0xFF800000> : vector<16xf32>
    %58 = vector.multi_reduction <maximumf>, %56, %cst_30 [1] : vector<16x16xf32> to vector<16xf32>
    %59 = vector.shape_cast %58 : vector<16xf32> to vector<16x1xf32>
    %60 = vector.broadcast %59 : vector<16x1xf32> to vector<16x16xf32>
    %61 = arith.subf %56, %60 : vector<16x16xf32>
    %62 = math.exp %61 : vector<16x16xf32>
    %cst_31 = arith.constant dense<0.000000e+00> : vector<16xf32>
    %63 = vector.multi_reduction <add>, %62, %cst_31 [1] : vector<16x16xf32> to vector<16xf32>
    %64 = vector.shape_cast %63 : vector<16xf32> to vector<16x1xf32>
    %65 = vector.broadcast %64 : vector<16x1xf32> to vector<16x16xf32>
    %66 = arith.divf %62, %65 : vector<16x16xf32>
    %cst_32 = arith.constant dense<0xFF800000> : vector<16xf32>
    %67 = vector.multi_reduction <maximumf>, %57, %cst_32 [1] : vector<16x16xf32> to vector<16xf32>
    %68 = vector.shape_cast %67 : vector<16xf32> to vector<16x1xf32>
    %69 = vector.broadcast %68 : vector<16x1xf32> to vector<16x16xf32>
    %70 = arith.subf %57, %69 : vector<16x16xf32>
    %71 = math.exp %70 : vector<16x16xf32>
    %cst_33 = arith.constant dense<0.000000e+00> : vector<16xf32>
    %72 = vector.multi_reduction <add>, %71, %cst_33 [1] : vector<16x16xf32> to vector<16xf32>
    %73 = vector.shape_cast %72 : vector<16xf32> to vector<16x1xf32>
    %74 = vector.broadcast %73 : vector<16x1xf32> to vector<16x16xf32>
    %75 = arith.divf %71, %74 : vector<16x16xf32>
    %76 = vector.extract_strided_slice %19 {offsets = [0, 32], sizes = [16, 32], strides = [1, 1]} : vector<16x64xf32> to vector<16x32xf32>
    %cst_34 = arith.constant dense<0.000000e+00> : vector<16x32xf32>
    %77 = tpu.matmul %66, %76, %cst_34 {dimension_numbers = #tpu.dot_dimension_numbers<[1], [0], [0], [1], [0, 0, 1, 1], [], []>} : vector<16x16xf32>, vector<16x32xf32>, vector<16x32xf32> -> vector<16x32xf32>
    %78 = vector.extract_strided_slice %16 {offsets = [0, 32], sizes = [16, 32], strides = [1, 1]} : vector<16x64xf32> to vector<16x32xf32>
    %cst_35 = arith.constant dense<0.000000e+00> : vector<16x32xf32>
    %79 = tpu.matmul %75, %78, %cst_35 {dimension_numbers = #tpu.dot_dimension_numbers<[1], [0], [0], [1], [0, 0, 1, 1], [], []>} : vector<16x16xf32>, vector<16x32xf32>, vector<16x32xf32> -> vector<16x32xf32>
    %c0_36 = arith.constant 0 : index
    %c0_37 = arith.constant 0 : index
    %80 = vector.load %arg7[%c0_36, %c0_37] : memref<64x64xf32, #tpu.memory_space<vmem>>, vector<64x64xf32>
    %c0_38 = arith.constant 0 : index
    %c0_39 = arith.constant 0 : index
    %81 = vector.load %arg8[%c0_38, %c0_39] : memref<1x64xf32, #tpu.memory_space<vmem>>, vector<1x64xf32>
    %82 = tpu.concatenate %47, %77 in 1 : vector<16x32xf32>, vector<16x32xf32> -> vector<16x64xf32>
    %cst_40 = arith.constant dense<0.000000e+00> : vector<16x64xf32>
    %83 = tpu.matmul %82, %80, %cst_40 {dimension_numbers = #tpu.dot_dimension_numbers<[1], [0], [0], [1], [0, 0, 1, 1], [], []>} : vector<16x64xf32>, vector<64x64xf32>, vector<16x64xf32> -> vector<16x64xf32>
    %84 = vector.broadcast %81 : vector<1x64xf32> to vector<16x64xf32>
    %85 = arith.addf %83, %84 : vector<16x64xf32>
    %86 = tpu.concatenate %49, %79 in 1 : vector<16x32xf32>, vector<16x32xf32> -> vector<16x64xf32>
    %cst_41 = arith.constant dense<0.000000e+00> : vector<16x64xf32>
    %87 = tpu.matmul %86, %80, %cst_41 {dimension_numbers = #tpu.dot_dimension_numbers<[1], [0], [0], [1], [0, 0, 1, 1], [], []>} : vector<16x64xf32>, vector<64x64xf32>, vector<16x64xf32> -> vector<16x64xf32>
    %88 = vector.broadcast %81 : vector<1x64xf32> to vector<16x64xf32>
    %89 = arith.addf %87, %88 : vector<16x64xf32>
    %c0_42 = arith.constant 0 : index
    %c0_43 = arith.constant 0 : index
    %c0_44 = arith.constant 0 : index
    %90 = vector.load %arg9[%c0_42, %c0_43, %c0_44] : memref<1x16x64xf32, #tpu.memory_space<vmem>>, vector<1x16x64xf32>
    %91 = vector.shape_cast %90 : vector<1x16x64xf32> to vector<16x64xf32>
    %92 = vector.shape_cast %85 : vector<16x64xf32> to vector<1x16x64xf32>
    tpu.vector_store %arg9[%c0_42, %c0_43, %c0_44], %92 {strides = array<i32>} : memref<1x16x64xf32, #tpu.memory_space<vmem>>, vector<1x16x64xf32>,
    %c0_45 = arith.constant 0 : index
    %c0_46 = arith.constant 0 : index
    %c0_47 = arith.constant 0 : index
    %93 = vector.load %arg10[%c0_45, %c0_46, %c0_47] : memref<1x16x64xf32, #tpu.memory_space<vmem>>, vector<1x16x64xf32>
    %94 = vector.shape_cast %93 : vector<1x16x64xf32> to vector<16x64xf32>
    %95 = vector.shape_cast %89 : vector<16x64xf32> to vector<1x16x64xf32>
    tpu.vector_store %arg10[%c0_45, %c0_46, %c0_47], %95 {strides = array<i32>} : memref<1x16x64xf32, #tpu.memory_space<vmem>>, vector<1x16x64xf32>,
    return
  }
  func.func @transform_0(%arg0: i32) -> (i32, i32, i32) {
    %c0_i32 = arith.constant 0 : i32
    %c0_i32_0 = arith.constant 0 : i32
    %c0_i32_1 = arith.constant 0 : i32
    return %arg0, %c0_i32, %c0_i32_0 : i32, i32, i32
  }
  func.func @transform_1(%arg0: i32) -> (i32, i32, i32) {
    %c0_i32 = arith.constant 0 : i32
    %c0_i32_0 = arith.constant 0 : i32
    %c0_i32_1 = arith.constant 0 : i32
    return %arg0, %c0_i32, %c0_i32_0 : i32, i32, i32
  }
  func.func @transform_2(%arg0: i32) -> (i32, i32) {
    %c0_i32 = arith.constant 0 : i32
    %c0_i32_0 = arith.constant 0 : i32
    %c0_i32_1 = arith.constant 0 : i32
    return %c0_i32, %c0_i32_0 : i32, i32
  }
  func.func @transform_3(%arg0: i32) -> (i32, i32) {
    %c0_i32 = arith.constant 0 : i32
    %c0_i32_0 = arith.constant 0 : i32
    %c0_i32_1 = arith.constant 0 : i32
    return %c0_i32, %c0_i32_0 : i32, i32
  }
  func.func @transform_4(%arg0: i32) -> (i32, i32) {
    %c0_i32 = arith.constant 0 : i32
    %c0_i32_0 = arith.constant 0 : i32
    %c0_i32_1 = arith.constant 0 : i32
    return %c0_i32, %c0_i32_0 : i32, i32
  }
  func.func @transform_5(%arg0: i32) -> (i32, i32) {
    %c0_i32 = arith.constant 0 : i32
    %c0_i32_0 = arith.constant 0 : i32
    %c0_i32_1 = arith.constant 0 : i32
    return %c0_i32, %c0_i32_0 : i32, i32
  }
  func.func @transform_6(%arg0: i32) -> (i32, i32) {
    %c0_i32 = arith.constant 0 : i32
    %c0_i32_0 = arith.constant 0 : i32
    %c0_i32_1 = arith.constant 0 : i32
    return %c0_i32, %c0_i32_0 : i32, i32
  }
  func.func @transform_7(%arg0: i32) -> (i32, i32) {
    %c0_i32 = arith.constant 0 : i32
    %c0_i32_0 = arith.constant 0 : i32
    %c0_i32_1 = arith.constant 0 : i32
    return %c0_i32, %c0_i32_0 : i32, i32
  }
  func.func @transform_8(%arg0: i32) -> (i32, i32, i32) {
    %c0_i32 = arith.constant 0 : i32
    %c0_i32_0 = arith.constant 0 : i32
    %c0_i32_1 = arith.constant 0 : i32
    return %arg0, %c0_i32, %c0_i32_0 : i32, i32, i32
  }
  func.func @transform_9(%arg0: i32) -> (i32, i32, i32) {
    %c0_i32 = arith.constant 0 : i32
    %c0_i32_0 = arith.constant 0 : i32
    %c0_i32_1 = arith.constant 0 : i32
    return %arg0, %c0_i32, %c0_i32_0 : i32, i32, i32
  }
}

</mosaic_0001>

<bundles_post_ra>
// kernel: transformer_layer_forward.4
= control target key start
LH: loop header
LB: loop body
LE: loop exit
PB: predicated region body
PF: predicated region fallthrough
CT: control target
= control target key end

     0   :  { %s1049_s24 = smov 0   ;;  %s1296_s0 = inlined_call_operand.vmem [shape: f32[4,16,64], index: 0, kind: input, shape index: {}]   ;;  %s1297_s1 = inlined_call_operand.vmem [shape: f32[4,16,32], index: 1, kind: input, shape index: {}]   ;;  %s1298_s2 = inlined_call_operand.vmem [shape: f32[4,16,32], index: 2, kind: input, shape index: {}]   ;;  %s1299_s3 = inlined_call_operand.vmem [shape: f32[64,192], index: 3, kind: input, shape index: {}]   ;;  %s1300_s4 = inlined_call_operand.vmem [shape: f32[1,192], index: 4, kind: input, shape index: {}]   ;;  %s1301_s5 = inlined_call_operand.vmem [shape: f32[64,64], index: 5, kind: input, shape index: {}]   ;;  %s1302_s6 = inlined_call_operand.vmem [shape: f32[1,64], index: 6, kind: input, shape index: {}]   ;;  %s1303_s7 = inlined_call_operand.vmem [shape: f32[4,16,64], index: 7, kind: output, shape index: {}]  }
   0x1 LB: > { %s912_s25 = sadd.s32 4294967295, %s1000_s24   ;;  %p916_p0 = scmp.ge.s32.totalorder %s1000_s24, 1  ;;  %s1000_s24 = sphi %s1049_s24, %s17_s24  }
   0x2   : > { %p257_p1 = scmp.lt.s32.totalorder %s1000_s24, 5 }
   0x4   : > { %p258_p2 = pnand %p916_p0, %p257_p1 }
   0x5   : > { %p299_p3 = scmp.lt.s32.totalorder (!%p258_p2), %s912_s25, 3  ;;  %s1002_s17 = smov (!%p258_p2), 64  }
   0x6   : > { %261 = sbr.rel (%p258_p2) target bundleno = 1683 (0x693), region = 48  ;;  %s1003_s30 = smov (!%p258_p2), 48  }
   0x7   : > { %s1004_s8 = smov (!%p258_p2), 80   ;;  %s1005_s9 = smov (!%p258_p2), 112  }
   0x8   : > { %s1006_s10 = smov (!%p258_p2), 96   ;;  %s1007_s15 = smov (!%p258_p2), 16  }
   0x9   : > { %s1008_s16 = smov (!%p258_p2), 32  }
   0xb   : > { %v339_v0 = vld [vmem:[%s1299_s3 + $0x70] sm:$0xff]  ;;  %v337_v1 = vld [vmem:[%s1299_s3 + $0x60] sm:$0xff]  ;;  %s1305_s25 = smov (!%p299_p3, %s912_s25), 3  ;;  %vm347_vm0 = vcmask 523264   ;;  %vm420_vm1 = vcmask 130048   ;;  %vm469_vm2 = vcmask 261120  }
   0xc   : > { %362 = vmatpush.msra.mxu0 %v339_v0  ;;  %v335_v2 = vld [vmem:[%s1299_s3 + $0x50] sm:$0xff]  ;;  %v333_v3 = vld [vmem:[%s1299_s3 + $0x40] sm:$0xff]  ;;  %s1069_s11 = sshll.u32 %s1305_s25, 4 }
   0xd   : > { %s1075_s14 = scalar_lea.vmem %s1297_s1, %s1069_s11  ;;  %v331_v4 = vld [vmem:[%s1299_s3 + $0x30] sm:$0xff]  ;;  %v329_v6 = vld [vmem:[%s1299_s3 + $0x20] sm:$0xff]  ;;  %s303_s25 = scalar_lea.vmem %s1296_s0, %s1069_s11 }
   0xe   : > { %363 = vmatpush.msra.mxu0 %v337_v1  ;;  %v1081_v5 = vld [vmem:[%s1075_s14 + $0x8] sm:$0xff]  ;;  %v327_v7 = vld [vmem:[%s1299_s3 + $0x10] sm:$0xff]  ;;  %v325_v8 = vld [vmem:[%s1299_s3] sm:$0xff]  ;;  %s318_s12 = scalar_lea.vmem %s1303_s7, %s1069_s11 }
   0xf   : > { %431 = vrot.lane.b32.xlu2 %v1081_v5, %s1002_s17  ;;  %v1098_v9 = vld [vmem:[%s303_s25] sm:$0xff]  ;;  %v1102_v10 = vld [vmem:[%s303_s25 + $0x8] sm:$0xff] }
  0x10   : > { %364 = vmatpush.msra.mxu0 %v335_v2  ;;  %v1109_v11 = vld [vmem:[%s1300_s4] sm:$0x3] }
  0x11   : > { %v343_v12 = vperm.slane %v1109_v11, 0  ;;  %v1123_v19 = vld [vmem:[%s1075_s14] sm:$0xff]  ;;  %s313_s14 = scalar_lea.vmem %s1298_s2, %s1069_s11 }
  0x12   : > { %365 = vmatpush.msra.mxu0 %v333_v3  ;;  %v323_v21 = vld [vmem:[%s313_s14] sm:$0xff]  ;;  %v1142_v26 = vld [vmem:[%s313_s14 + $0x8] sm:$0xff] }
  0x14   : > { %366 = vmatpush.msra.mxu0 %v331_v4 }
  0x16   : > { %367 = vmatpush.msra.mxu0 %v329_v6  ;;  %v340_v6 = vld [vmem:[%s1299_s3 + $0x78] sm:$0xff] }
  0x17   : > { %385 = vmatpush.msra.mxu1 %v340_v6 }
  0x18   : > { %368 = vmatpush.msra.mxu0 %v327_v7  ;;  %v338_v7 = vld [vmem:[%s1299_s3 + $0x68] sm:$0xff] }
  0x19   : > { %386 = vmatpush.msra.mxu1 %v338_v7 }
  0x1a   : > { %369 = vmatpush.msra.mxu0 %v325_v8 }
  0x1b   : > { %925 = vmatmul.msk.f32.vlgmr.msra.gmra.mxu0 %vm347_vm0, %v1098_v9 }
  0x23   : > { %926 = vmatmul.msk.f32.gmra.mxu0 %vm347_vm0, %v1102_v10 }
  0x69   : > { %v432_v30 = vpop.permute.xlu2 %431 }
  0x98   : > { %v371_v13 = vpop.f32.mrf.mxu0 }
  0x99   : > { %v1112_v14 = vadd.f32 %v371_v13, %v343_v12 }
  0x9b   : > { %v402_v15 = vsub.f32 0.0, %v1112_v14  ;;  %v400_v47 = vmul.f32 %v1112_v14, %v1123_v19 }
  0x9d   : > { %437 = vrot.lane.b32.xlu1 %v402_v15, %s1003_s30 }
  0xa0   : > { %v374_v16 = vpop.f32.mrf.mxu0 }
  0xa1   : > { %v1115_v17 = vadd.f32 %v374_v16, %v343_v12  ;;  %v334_v12 = vld [vmem:[%s1299_s3 + $0x48] sm:$0xff] }
  0xa3   : > { %v403_v18 = vsub.f32 0.0, %v1115_v17  ;;  %v436_v31 = vmul.f32 %v432_v30, %v1115_v17  ;;  %v401_v53 = vmul.f32 %v1115_v17, %v1081_v5 }
  0xa5   : > { %439 = vrot.lane.b32.xlu0 %v403_v18, %s1003_s30  ;;  %443 = vrot.lane.b32.xlu1 %v1112_v14, %s1004_s8 }
  0xad   : > { %445 = vrot.lane.b32.xlu0 %v1115_v17, %s1004_s8 }
  0xb5   : > { %429 = vrot.lane.b32.xlu0 %v1123_v19, %s1002_s17 }
  0xbd   : > { %406 = vrot.lane.b32.xlu0 %v402_v15, %s1005_s9 }
  0xc5   : > { %408 = vrot.lane.b32.xlu0 %v403_v18, %s1005_s9 }
  0xcd   : > { %632 = vrot.lane.b32.xlu0 %v1115_v17, %s1003_s30 }
  0xd5   : > { %630 = vrot.lane.b32.xlu0 %v1112_v14, %s1003_s30 }
  0xdd   : > { %596 = vrot.lane.b32.xlu0 %v1112_v14, %s1005_s9 }
  0xe5   : > { %592 = vrot.lane.b32.xlu0 %v403_v18, %s1004_s8 }
  0xed   : > { %598 = vrot.lane.b32.xlu0 %v1115_v17, %s1005_s9 }
  0xf5   : > { %618 = vrot.lane.b32.xlu0 %v1081_v5, %s1006_s10 }
  0xfd   : > { %616 = vrot.lane.b32.xlu0 %v1123_v19, %s1006_s10 }
 0x10f   : > { %v438_v20 = vpop.permute.xlu1 %437 }
 0x117   : > { %v440_v22 = vpop.permute.xlu0 %439  ;;  %v444_v23 = vpop.permute.xlu1 %443 }
 0x118   : > { %v449_v24 = vsel %vm420_vm1, %v438_v20, %v444_v23  ;;  %v328_v20 = vld [vmem:[%s1299_s3 + $0x18] sm:$0xff] }
 0x119   : > { %v451_v25 = vmul.f32 %v449_v24, %v323_v21 }
 0x11b   : > { %455 = vrot.lane.b32.xlu1 %v451_v25, %s1002_s17 }
 0x11f   : > { %v446_v27 = vpop.permute.xlu0 %445 }
 0x120   : > { %v450_v28 = vsel %vm420_vm1, %v440_v22, %v446_v27 }
 0x121   : > { %v452_v29 = vmul.f32 %v450_v28, %v1142_v26 }
 0x123   : > { %457 = vrot.lane.b32.xlu2 %v452_v29, %s1002_s17  ;;  %414 = vrot.lane.b32.xlu1 %v1112_v14, %s1007_s15 }
 0x127   : > { %v430_v34 = vpop.permute.xlu0 %429 }
 0x128   : > { %v435_v35 = vmul.f32 %v430_v34, %v1112_v14 }
 0x12b   : > { %416 = vrot.lane.b32.xlu1 %v1115_v17, %s1007_s15 }
 0x12f   : > { %v407_v38 = vpop.permute.xlu0 %406 }
 0x137   : > { %v409_v40 = vpop.permute.xlu0 %408 }
 0x13f   : > { %v633_v43 = vpop.permute.xlu0 %632 }
 0x147   : > { %v631_v50 = vpop.permute.xlu0 %630 }
 0x14f   : > { %v597_v55 = vpop.permute.xlu0 %596 }
 0x157   : > { %v593_v61 = vpop.permute.xlu0 %592 }
 0x15f   : > { %v599_v63 = vpop.permute.xlu0 %598 }
 0x160   : > { %v603_v0 = vsel %vm420_vm1, %v593_v61, %v599_v63 }
 0x161   : > { %v605_v1 = vmul.f32 %v603_v0, %v1142_v26 }
 0x167   : > { %v619_v24 = vpop.permute.xlu0 %618 }
 0x16f   : > { %v617_v25 = vpop.permute.xlu0 %616 }
 0x17d   : > { %v458_v32 = vpop.permute.xlu2 %457 }
 0x17e   : > { %v462_v33 = vadd.f32 %v458_v32, %v436_v31 }
 0x180   : > { %467 = vrot.lane.b32.xlu2 %v462_v33, %s1002_s17 }
 0x18d   : > { %v456_v36 = vpop.permute.xlu1 %455 }
 0x18e   : > { %v461_v37 = vadd.f32 %v456_v36, %v435_v35  ;;  %v623_v35 = vmul.f32 %v619_v24, %v1115_v17 }
 0x190   : > { %465 = vrot.lane.b32.xlu2 %v461_v37, %s1002_s17 }
 0x195   : > { %v415_v41 = vpop.permute.xlu1 %414 }
 0x196   : > { %v421_v42 = vsel %vm420_vm1, %v407_v38, %v415_v41 }
 0x197   : > { %v423_v44 = vmul.f32 %v421_v42, %v323_v21 }
 0x198   : > { %626 = vrot.lane.b32.xlu2 %v403_v18, %s1007_s15  ;;  %v330_v18 = vld [vmem:[%s1299_s3 + $0x28] sm:$0xff] }
 0x199   : > { %v425_v48 = vadd.f32 %v423_v44, %v400_v47 }
 0x19d   : > { %v417_v45 = vpop.permute.xlu1 %416 }
 0x19e   : > { %v422_v49 = vsel %vm420_vm1, %v409_v40, %v417_v45 }
 0x19f   : > { %v424_v51 = vmul.f32 %v422_v49, %v1142_v26 }
 0x1a0   : > { %624 = vrot.lane.b32.xlu2 %v402_v15, %s1007_s15 }
 0x1a1   : > { %v426_v54 = vadd.f32 %v424_v51, %v401_v53 }
 0x1a8   : > { %590 = vrot.lane.b32.xlu2 %v402_v15, %s1004_s8  ;;  %v332_v15 = vld [vmem:[%s1299_s3 + $0x38] sm:$0xff] }
 0x1da   : > { %v468_v39 = vpop.permute.xlu2 %467 }
 0x1db   : > { %929 = vmatpush.xpose.msk.msra.mxu2 %vm469_vm2, %v468_v39  ;;  %v622_v39 = vmul.f32 %v617_v25, %v1112_v14 }
 0x1ea   : > { %v466_v46 = vpop.permute.xlu2 %465 }
 0x1eb   : > { %930 = vmatpush.xpose.msk.msra.mxu2 %vm469_vm2, %v466_v46 }
 0x1ee   : > { %931 = vmatmul.msk.f32.vlgmr.msra.gmra.mxu2 %vm469_vm2, %v425_v48  ;;  %v344_v48 = vperm.slane %v1109_v11, 1 }
 0x1f2   : > { %v627_v52 = vpop.permute.xlu2 %626 }
 0x1f3   : > { %v637_v22 = vsel %vm420_vm1, %v627_v52, %v633_v43 }
 0x1f4   : > { %v639_v23 = vmul.f32 %v637_v22, %v1142_v26 }
 0x1f6   : > { %932 = vmatmul.msk.f32.gmra.mxu2 %vm469_vm2, %v426_v54 }
 0x1fa   : > { %v625_v56 = vpop.permute.xlu2 %624 }
 0x1fb   : > { %v636_v57 = vsel %vm420_vm1, %v625_v56, %v631_v50 }
 0x1fc   : > { %v638_v58 = vmul.f32 %v636_v57, %v323_v21 }
 0x1fe   : > { %642 = vrot.lane.b32.xlu0 %v638_v58, %s1006_s10 }
 0x202   : > { %v591_v59 = vpop.permute.xlu2 %590 }
 0x203   : > { %v602_v60 = vsel %vm420_vm1, %v591_v59, %v597_v55 }
 0x204   : > { %v604_v62 = vmul.f32 %v602_v60, %v323_v21  ;;  %v326_v21 = vld [vmem:[%s1299_s3 + $0x8] sm:$0xff] }
 0x206   : > { %608 = vrot.lane.b32.xlu0 %v604_v62, %s1008_s16 }
 0x20e   : > { %584 = vrot.lane.b32.xlu0 %v1081_v5, %s1008_s16  ;;  %v336_v5 = vld [vmem:[%s1299_s3 + $0x58] sm:$0xff] }
 0x20f   : > { %387 = vmatpush.msra.mxu1 %v336_v5 }
 0x211   : > { %388 = vmatpush.msra.mxu1 %v334_v12 }
 0x213   : > { %389 = vmatpush.msra.mxu1 %v332_v15 }
 0x215   : > { %390 = vmatpush.msra.mxu1 %v330_v18 }
 0x216   : > { %610 = vrot.lane.b32.xlu0 %v605_v1, %s1008_s16 }
 0x217   : > { %391 = vmatpush.msra.mxu1 %v328_v20 }
 0x219   : > { %392 = vmatpush.msra.mxu1 %v326_v21 }
 0x21a   : > { %927 = vmatmul.msk.f32.vlgmr.msra.gmra.mxu1 %vm347_vm0, %v1098_v9 }
 0x222   : > { %928 = vmatmul.msk.f32.gmra.mxu1 %vm347_vm0, %v1102_v10 }
 0x270   : > { %v643_v29 = vpop.permute.xlu0 %642 }
 0x271   : > { %v497_v2 = vpop.f32.mrf.mxu2  ;;  %v648_v40 = vadd.f32 %v643_v29, %v622_v39 }
 0x272   : > { %v503_v3 = vmul.f32 0.17677669, %v497_v2 }
 0x274   : > { %v505_v4 = vsel %vm420_vm1, %v503_v3, -inf }
 0x275   : > { %506 = vmax.xlane.f32.xlu1 %v505_v4 }
 0x278   : > { %v609_v34 = vpop.permute.xlu0 %608 }
 0x279   : > { %v500_v8 = vpop.f32.mrf.mxu2 }
 0x27a   : > { %v504_v13 = vmul.f32 0.17677669, %v500_v8 }
 0x27c   : > { %v508_v16 = vsel %vm420_vm1, %v504_v13, -inf }
 0x27d   : > { %509 = vmax.xlane.f32.xlu2 %v508_v16 }
 0x280   : > { %v585_v36 = vpop.permute.xlu0 %584 }
 0x281   : > { %v589_v42 = vmul.f32 %v585_v36, %v1115_v17 }
 0x288   : > { %v611_v41 = vpop.permute.xlu0 %610 }
 0x289   : > { %v615_v44 = vadd.f32 %v611_v41, %v589_v42 }
 0x28e   : > { %644 = vrot.lane.b32.xlu1 %v639_v23, %s1006_s10 }
 0x295   : > { %582 = vrot.lane.b32.xlu2 %v1123_v19, %s1008_s16 }
 0x297   : > { %v394_v47 = vpop.f32.mrf.mxu1 }
 0x298   : > { %v1223_v50 = vadd.f32 %v394_v47, %v344_v48 }
 0x29f   : > { %v397_v49 = vpop.f32.mrf.mxu1 }
 0x2a0   : > { %v1225_v51 = vadd.f32 %v397_v49, %v344_v48 }
 0x2a2   : > { %573 = vmatpush.msra.mxu3 %v1225_v51  ;;  %v972_v17 = vpack.i.bf16 %v1223_v50, %v1225_v51 }
 0x2a4   : > { %574 = vmatpush.msra.mxu3 %v1223_v50 }
 0x2e8   : > { %v507_v27 = vpop.xlane.xlu1 %506 }
 0x2e9   : > { %v511_v28 = vsub.f32 %v503_v3, %v507_v27 }
 0x2eb   : > { %v513_v30 = vmul.f32 1.442695, %v511_v28 }
 0x2ed   : > { %978 = vpow2.f32 %v513_v30 }
 0x2f0   : > { %v510_v9 = vpop.xlane.xlu2 %509 }
 0x2f1   : > { %v512_v31 = vsub.f32 %v504_v13, %v510_v9 }
 0x2f3   : > { %v979_v32 = vpop.eup %978  ;;  %v515_v33 = vmul.f32 1.442695, %v512_v31 }
 0x2f4   : > { %v517_v26 = vsel %vm420_vm1, %v979_v32, 0.0 }
 0x2f5   : > { %980 = vpow2.f32 %v515_v33  ;;  %518 = vadd.xlane.f32.xlu1 %v517_v26 }
 0x2f8   : > { %v583_v43 = vpop.permute.xlu2 %582 }
 0x2f9   : > { %v588_v45 = vmul.f32 %v583_v43, %v1112_v14 }
 0x2fb   : > { %v1210_v10 = vpop.eup %980  ;;  %v614_v46 = vadd.f32 %v609_v34, %v588_v45 }
 0x2fc   : > { %v520_v19 = vsel %vm420_vm1, %v1210_v10, 0.0 }
 0x2fd   : > { %521 = vadd.xlane.f32.xlu2 %v520_v19 }
 0x300   : > { %v645_v37 = vpop.permute.xlu1 %644 }
 0x301   : > { %v649_v38 = vadd.f32 %v645_v37, %v623_v35 }
 0x303   : > { %660 = vrot.lane.b32.xlu0 %v649_v38, %s1008_s16 }
 0x30b   : > { %658 = vrot.lane.b32.xlu0 %v648_v40, %s1008_s16 }
 0x30e   : > { %654 = vrot.lane.b32.xlu1 %v615_v44, %s1006_s10 }
 0x313   : > { %652 = vrot.lane.b32.xlu0 %v614_v46, %s1006_s10 }
 0x368   : > { %v519_v14 = vpop.xlane.xlu1 %518 }
 0x369   : > { %982 = vrcp.f32 %v519_v14  ;;  %v534_v11 = vand.u32 2147483648, %v519_v14  ;;  %v532_v57 = vand.u32 2147483647, %v519_v14  ;;  %vm528_vm4 = vweird.f32 %v519_v14 }
 0x36b   : > { %v535_v61 = vor.u32 1.1754944e-38, %v534_v11  ;;  %vm533_vm6 = vcmp.eq.f32.partialorder %v532_v57, 8.507059e+37 }
 0x36f   : > { %v983_v52 = vpop.eup %982 }
 0x370   : > { %v524_v53 = vmul.f32 %v983_v52, %v519_v14  ;;  %v522_v54 = vpop.xlane.xlu2 %521  ;;  %vm529_vm3 = vweird.f32 %v983_v52 }
 0x371   : > { %984 = vrcp.f32 %v522_v54  ;;  %vm530_vm5 = vmor %vm528_vm4, %vm529_vm3  ;;  %v549_v3 = vand.u32 2147483648, %v522_v54  ;;  %v547_v6 = vand.u32 2147483647, %v522_v54  ;;  %vm543_vm8 = vweird.f32 %v522_v54 }
 0x372   : > { %v525_v55 = vsub.f32 1.0, %v524_v53 }
 0x373   : > { %v550_v8 = vor.u32 1.1754944e-38, %v549_v3  ;;  %vm548_vm10 = vcmp.eq.f32.partialorder %v547_v6, 8.507059e+37 }
 0x374   : > { %v526_v56 = vmul.f32 %v983_v52, %v525_v55 }
 0x375   : > { %v661_v58 = vpop.permute.xlu0 %660 }
 0x376   : > { %935 = vmatpush.xpose.msk.msrb.mxu3 %vm469_vm2, %v661_v58  ;;  %v527_v59 = vadd.f32 %v983_v52, %v526_v56 }
 0x377   : > { %v985_v60 = vpop.eup %984 }
 0x378   : > { %v539_v62 = vmul.f32 %v985_v60, %v522_v54  ;;  %v531_v63 = vsel %vm530_vm5, %v983_v52, %v527_v59  ;;  %vm544_vm7 = vweird.f32 %v985_v60  ;;  %v797_v59 = vld [vmem:[%s1301_s5 + $0x38] sm:$0xff] }
 0x379   : > { %v536_v0 = vsel %vm533_vm6, %v535_v61, %v531_v63  ;;  %vm545_vm9 = vmor %vm543_vm8, %vm544_vm7  ;;  %949 = vmatpush.msrb.mxu1 %v797_v59  ;;  %816 = vmatpush.msrb.mxu0 %v797_v59  ;;  %v795_v61 = vld [vmem:[%s1301_s5 + $0x28] sm:$0xff]  ;;  %v793_v63 = vld [vmem:[%s1301_s5 + $0x18] sm:$0xff] }
 0x37a   : > { %v540_v1 = vsub.f32 1.0, %v539_v62  ;;  %v537_v2 = vmul.f32 %v979_v32, %v536_v0  ;;  %v794_v62 = vld [vmem:[%s1301_s5 + $0x20] sm:$0xff]  ;;  %v792_v0 = vld [vmem:[%s1301_s5 + $0x10] sm:$0xff] }
 0x37c   : > { %v541_v4 = vmul.f32 %v985_v60, %v540_v1  ;;  %933 = vmatmul.msk.f32.vlgmr.msra.gmra.mxu3 %vm420_vm1, %v537_v2  ;;  %v791_v1 = vld [vmem:[%s1301_s5 + $0x8] sm:$0xff] }
 0x37d   : > { %v659_v7 = vpop.permute.xlu0 %658 }
 0x37e   : > { %936 = vmatpush.xpose.msk.msrb.mxu3 %vm469_vm2, %v659_v7  ;;  %v542_v5 = vadd.f32 %v985_v60, %v541_v4  ;;  %v790_v4 = vld [vmem:[%s1301_s5] sm:$0xff] }
 0x380   : > { %v546_v12 = vsel %vm545_vm9, %v985_v60, %v542_v5  ;;  %v655_v18 = vpop.permute.xlu1 %654  ;;  %v796_v60 = vld [vmem:[%s1301_s5 + $0x30] sm:$0xff] }
 0x381   : > { %v551_v13 = vsel %vm548_vm10, %v550_v8, %v546_v12  ;;  %950 = vmatpush.msrb.mxu1 %v796_v60  ;;  %817 = vmatpush.msrb.mxu0 %v796_v60  ;;  %v977_v12 = vld [vmem:[%s1302_s6] ss:$0 sm:$0xff] }
 0x382   : > { %v552_v15 = vmul.f32 %v1210_v10, %v551_v13 }
 0x383   : > { %951 = vmatpush.msrb.mxu1 %v795_v61  ;;  %818 = vmatpush.msrb.mxu0 %v795_v61 }
 0x384   : > { %934 = vmatmul.msk.f32.gmra.mxu3 %vm420_vm1, %v552_v15 }
 0x385   : > { %v653_v16 = vpop.permute.xlu0 %652  ;;  %952 = vmatpush.msrb.mxu1 %v794_v62  ;;  %819 = vmatpush.msrb.mxu0 %v794_v62 }
 0x387   : > { %953 = vmatpush.msrb.mxu1 %v793_v63  ;;  %820 = vmatpush.msrb.mxu0 %v793_v63 }
 0x389   : > { %954 = vmatpush.msrb.mxu1 %v792_v0  ;;  %821 = vmatpush.msrb.mxu0 %v792_v0 }
 0x38b   : > { %955 = vmatpush.msrb.mxu1 %v791_v1  ;;  %822 = vmatpush.msrb.mxu0 %v791_v1 }
 0x38c   : > { %937 = vmatmul.msk.f32.vlgmr.msrb.gmra.mxu3 %vm469_vm2, %v653_v16 }
 0x38d   : > { %956 = vmatpush.msrb.mxu1 %v790_v4  ;;  %823 = vmatpush.msrb.mxu0 %v790_v4 }
 0x394   : > { %938 = vmatmul.msk.f32.gmra.mxu3 %vm469_vm2, %v655_v18 }
 0x3ff   : > { %v1238_v20 = vpop.f32.mrf.mxu3 }
 0x407   : > { %v1240_v21 = vpop.f32.mrf.mxu3 }
 0x40f   : > { %v687_v22 = vpop.f32.mrf.mxu3 }
 0x410   : > { %v693_v23 = vmul.f32 0.17677669, %v687_v22 }
 0x412   : > { %v695_v24 = vsel %vm420_vm1, %v693_v23, -inf }
 0x413   : > { %696 = vmax.xlane.f32.xlu0 %v695_v24 }
 0x417   : > { %v690_v25 = vpop.f32.mrf.mxu3 }
 0x418   : > { %v694_v27 = vmul.f32 0.17677669, %v690_v25 }
 0x41a   : > { %v698_v28 = vsel %vm420_vm1, %v694_v27, -inf }
 0x41b   : > { %699 = vmax.xlane.f32.xlu2 %v698_v28 }
 0x486   : > { %v697_v29 = vpop.xlane.xlu0 %696 }
 0x487   : > { %v701_v30 = vsub.f32 %v693_v23, %v697_v29 }
 0x489   : > { %v703_v9 = vmul.f32 1.442695, %v701_v30 }
 0x48b   : > { %986 = vpow2.f32 %v703_v9 }
 0x48e   : > { %v700_v31 = vpop.xlane.xlu2 %699 }
 0x48f   : > { %v702_v32 = vsub.f32 %v694_v27, %v700_v31 }
 0x491   : > { %v987_v33 = vpop.eup %986  ;;  %v705_v26 = vmul.f32 1.442695, %v702_v32 }
 0x492   : > { %v707_v34 = vsel %vm420_vm1, %v987_v33, 0.0 }
 0x493   : > { %988 = vpow2.f32 %v705_v26  ;;  %708 = vadd.xlane.f32.xlu2 %v707_v34 }
 0x499   : > { %v989_v10 = vpop.eup %988 }
 0x49a   : > { %v710_v19 = vsel %vm420_vm1, %v989_v10, 0.0 }
 0x49b   : > { %711 = vadd.xlane.f32.xlu1 %v710_v19 }
 0x4ab   : > { %973 = vrot.lane.b32.xlu2 %v972_v17, %s1006_s10 }
 0x506   : > { %v709_v35 = vpop.xlane.xlu2 %708 }
 0x507   : > { %990 = vrcp.f32 %v709_v35  ;;  %v724_v42 = vand.u32 2147483648, %v709_v35  ;;  %v722_v44 = vand.u32 2147483647, %v709_v35  ;;  %vm718_vm12 = vweird.f32 %v709_v35 }
 0x509   : > { %v725_v48 = vor.u32 1.1754944e-38, %v724_v42  ;;  %vm723_vm14 = vcmp.eq.f32.partialorder %v722_v44, 8.507059e+37 }
 0x50d   : > { %v991_v36 = vpop.eup %990 }
 0x50e   : > { %v714_v37 = vmul.f32 %v991_v36, %v709_v35  ;;  %v712_v38 = vpop.xlane.xlu1 %711  ;;  %v974_v39 = vpop.permute.xlu2 %973  ;;  %vm719_vm11 = vweird.f32 %v991_v36 }
 0x50f   : > { %992 = vrcp.f32 %v712_v38  ;;  %v975_v41 = vunpack.i.l.bf16 %v974_v39  ;;  %v976_v45 = vunpack.i.h.bf16 %v974_v39  ;;  %vm720_vm13 = vmor %vm718_vm12, %vm719_vm11  ;;  %v739_v52 = vand.u32 2147483648, %v712_v38 }
 0x510   : > { %v715_v40 = vsub.f32 1.0, %v714_v37  ;;  %v737_v54 = vand.u32 2147483647, %v712_v38  ;;  %vm733_vm3 = vweird.f32 %v712_v38 }
 0x511   : > { %771 = vmatpush.msrb.mxu2 %v975_v41  ;;  %v740_v11 = vor.u32 1.1754944e-38, %v739_v52 }
 0x512   : > { %v716_v43 = vmul.f32 %v991_v36, %v715_v40  ;;  %vm738_vm5 = vcmp.eq.f32.partialorder %v737_v54, 8.507059e+37 }
 0x513   : > { %772 = vmatpush.msrb.mxu2 %v976_v45 }
 0x514   : > { %v717_v46 = vadd.f32 %v991_v36, %v716_v43 }
 0x515   : > { %v993_v47 = vpop.eup %992 }
 0x516   : > { %v729_v49 = vmul.f32 %v993_v47, %v712_v38  ;;  %v721_v50 = vsel %vm720_vm13, %v991_v36, %v717_v46  ;;  %vm734_vm15 = vweird.f32 %v993_v47 }
 0x517   : > { %v726_v51 = vsel %vm723_vm14, %v725_v48, %v721_v50  ;;  %vm735_vm4 = vmor %vm733_vm3, %vm734_vm15 }
 0x518   : > { %v730_v17 = vsub.f32 1.0, %v729_v49  ;;  %v727_v14 = vmul.f32 %v987_v33, %v726_v51 }
 0x51a   : > { %v731_v53 = vmul.f32 %v993_v47, %v730_v17  ;;  %939 = vmatmul.msk.f32.vlgmr.msrb.gmra.mxu2 %vm420_vm1, %v727_v14 }
 0x51c   : > { %v732_v55 = vadd.f32 %v993_v47, %v731_v53 }
 0x51e   : > { %v736_v56 = vsel %vm735_vm4, %v993_v47, %v732_v55 }
 0x51f   : > { %v741_v57 = vsel %vm738_vm5, %v740_v11, %v736_v56 }
 0x520   : > { %v742_v58 = vmul.f32 %v989_v10, %v741_v57 }
 0x522   : > { %940 = vmatmul.msk.f32.gmra.mxu2 %vm420_vm1, %v742_v58 }
 0x59d   : > { %v774_v2 = vpop.f32.mrf.mxu2 }
 0x59e   : > { %782 = vrot.lane.b32.xlu0 %v774_v2, %s1008_s16 }
 0x5a5   : > { %v777_v3 = vpop.f32.mrf.mxu2 }
 0x5a6   : > { %784 = vrot.lane.b32.xlu2 %v777_v3, %s1008_s16 }
 0x600   : > { %v785_v6 = vpop.permute.xlu2 %784 }
 0x601   : > { %v789_v7 = vsel %vm469_vm2, %v1240_v21, %v785_v6 }
 0x602   : > { %942 = vmatmul.msk.f32.vlgmr.msrb.gmra.mxu1 %vm347_vm0, %v789_v7 }
 0x610   : > { %v783_v5 = vpop.permute.xlu0 %782 }
 0x611   : > { %v788_v8 = vsel %vm469_vm2, %v1238_v20, %v783_v5 }
 0x612   : > { %941 = vmatmul.msk.f32.vlgmr.msrb.gmra.mxu0 %vm347_vm0, %v788_v8 }
 0x67f   : > { %v828_v13 = vpop.f32.mrf.mxu1 }
 0x680   : > { %v829_v15 = vadd.f32 %v977_v12, %v828_v13 }
 0x682   : > { %832 = vst.msk [vmem:[%s318_s12 + $0x8] sm:$0xff] %vm347_vm0, %v829_v15 }
 0x68f   : > { %v825_v16 = vpop.f32.mrf.mxu0 }
 0x690   : > { %v826_v18 = vadd.f32 %v977_v12, %v825_v16 }
 0x692   : > { %831 = vst.msk [vmem:[%s318_s12] sm:$0xff] %vm347_vm0, %v826_v18 }
 0x693 PF: > { %s17_s24 = sadd.s32 1, %s1000_s24  }
 0x694   : > { %p14_p4 = scmp.ge.s32.totalorder %s17_s24, 6  }
 0x696   :  { %16 = sbr.rel (!%p14_p4) target bundleno = 1 (0x1), region = 84 }

// kernel: transformer_layer_forward.5
= control target key start
LH: loop header
LB: loop body
LE: loop exit
PB: predicated region body
PF: predicated region fallthrough
CT: control target
= control target key end

     0   :  { %vm64_vm0 = vcmask 523264   ;;  %s1001_s3 = inlined_call_operand.vmem [shape: f32[64,128], index: 3, kind: input, shape index: {}]   ;;  %s1002_s2 = inlined_call_operand.vmem [shape: f32[64,128], index: 2, kind: input, shape index: {}]   ;;  %s1003_s1 = inlined_call_operand.vmem [shape: f32[64,64], index: 1, kind: input, shape index: {}]   ;;  %s1004_s0 = inlined_call_operand.vmem [shape: f32[64,64], index: 0, kind: input, shape index: {}]   ;;  %s1005_s4 = inlined_call_operand.vmem [shape: f32[1,128], index: 4, kind: input, shape index: {}]   ;;  %s1006_s5 = inlined_call_operand.vmem [shape: f32[1,128], index: 5, kind: input, shape index: {}]   ;;  %s1007_s6 = inlined_call_operand.vmem [shape: f32[1,128], index: 6, kind: input, shape index: {}]   ;;  %s1008_s8 = inlined_call_operand.vmem [shape: f32[1,64], index: 8, kind: input, shape index: {}]   ;;  %s1009_s7 = inlined_call_operand.vmem [shape: f32[128,64], index: 7, kind: input, shape index: {}]   ;;  %s1010_s9 = inlined_call_operand.vmem [shape: f32[64,64], index: 9, kind: output, shape index: {}]  }
   0x1   :  { %v63_v0 = vld [vmem:[%s1001_s3 + $0x38] sm:$0xff]  ;;  %v62_v2 = vld [vmem:[%s1001_s3 + $0x30] sm:$0xff]  ;;  %v61_v4 = vld [vmem:[%s1001_s3 + $0x28] sm:$0xff] }
   0x2   :  { %v55_v1 = vld [vmem:[%s1002_s2 + $0x38] sm:$0xff]  ;;  %97 = vmatpush.msra.mxu0 %v63_v0  ;;  %v54_v3 = vld [vmem:[%s1002_s2 + $0x30] sm:$0xff]  ;;  %v53_v5 = vld [vmem:[%s1002_s2 + $0x28] sm:$0xff] }
   0x3   :  { %162 = vmatpush.msra.mxu1 %v55_v1  ;;  %v60_v6 = vld [vmem:[%s1001_s3 + $0x20] sm:$0xff]  ;;  %v59_v8 = vld [vmem:[%s1001_s3 + $0x18] sm:$0xff]  ;;  %v58_v10 = vld [vmem:[%s1001_s3 + $0x10] sm:$0xff]  ;;  %v622_v1 = vmov 128.0  }
   0x4   :  { %98 = vmatpush.msra.mxu0 %v62_v2  ;;  %v52_v7 = vld [vmem:[%s1002_s2 + $0x20] sm:$0xff]  ;;  %v51_v9 = vld [vmem:[%s1002_s2 + $0x18] sm:$0xff]  ;;  %v50_v11 = vld [vmem:[%s1002_s2 + $0x10] sm:$0xff]  ;;  %588 = vrcp.f32 %v622_v1 }
   0x5   :  { %163 = vmatpush.msra.mxu1 %v54_v3  ;;  %v57_v12 = vld [vmem:[%s1001_s3 + $0x8] sm:$0xff]  ;;  %v56_v14 = vld [vmem:[%s1001_s3] sm:$0xff]  ;;  %v42_v20 = vld [vmem:[%s1003_s1 + $0x10] sm:$0xff] }
   0x6   :  { %99 = vmatpush.msra.mxu0 %v61_v4  ;;  %v49_v13 = vld [vmem:[%s1002_s2 + $0x8] sm:$0xff]  ;;  %v48_v15 = vld [vmem:[%s1002_s2] sm:$0xff]  ;;  %v749_v21 = vld [vmem:[%s1004_s0 + $0x10] sm:$0xff] }
   0x7   :  { %164 = vmatpush.msra.mxu1 %v53_v5  ;;  %v40_v16 = vld [vmem:[%s1003_s1] sm:$0xff]  ;;  %v41_v18 = vld [vmem:[%s1003_s1 + $0x8] sm:$0xff]  ;;  %v43_v22 = vld [vmem:[%s1003_s1 + $0x18] sm:$0xff] }
   0x8   :  { %100 = vmatpush.msra.mxu0 %v60_v6  ;;  %v727_v17 = vld [vmem:[%s1004_s0] sm:$0xff]  ;;  %v738_v19 = vld [vmem:[%s1004_s0 + $0x8] sm:$0xff]  ;;  %v760_v23 = vld [vmem:[%s1004_s0 + $0x18] sm:$0xff] }
   0x9   :  { %165 = vmatpush.msra.mxu1 %v52_v7  ;;  %v44_v24 = vld [vmem:[%s1003_s1 + $0x20] sm:$0xff]  ;;  %v45_v26 = vld [vmem:[%s1003_s1 + $0x28] sm:$0xff]  ;;  %v46_v28 = vld [vmem:[%s1003_s1 + $0x30] sm:$0xff] }
   0xa   :  { %101 = vmatpush.msra.mxu0 %v59_v8  ;;  %v771_v25 = vld [vmem:[%s1004_s0 + $0x20] sm:$0xff]  ;;  %v782_v27 = vld [vmem:[%s1004_s0 + $0x28] sm:$0xff]  ;;  %v793_v29 = vld [vmem:[%s1004_s0 + $0x30] sm:$0xff]  ;;  %v589_v2 = vpop.eup %588 }
   0xb   :  { %166 = vmatpush.msra.mxu1 %v51_v9  ;;  %v47_v30 = vld [vmem:[%s1003_s1 + $0x38] sm:$0xff]  ;;  %v584_v32 = vld [vmem:[%s1005_s4] ss:$0 sm:$0xff]  ;;  %v224_v3 = vmul.f32 128.0, %v589_v2  ;;  %vm228_vm1 = vweird.f32 %v589_v2 }
   0xc   :  { %102 = vmatpush.msra.mxu0 %v58_v10  ;;  %v804_v31 = vld [vmem:[%s1004_s0 + $0x38] sm:$0xff] }
   0xd   :  { %167 = vmatpush.msra.mxu1 %v50_v11  ;;  %v225_v4 = vsub.f32 1.0, %v224_v3  ;;  %v473_v1 = vld [vmem:[%s1009_s7 + $0x18] sm:$0xff] }
   0xe   :  { %103 = vmatpush.msra.mxu0 %v57_v12 }
   0xf   :  { %168 = vmatpush.msra.mxu1 %v49_v13  ;;  %v226_v5 = vmul.f32 %v589_v2, %v225_v4 }
  0x10   :  { %104 = vmatpush.msra.mxu0 %v56_v14 }
  0x11   :  { %169 = vmatpush.msra.mxu1 %v48_v15  ;;  %551 = vmatmul.msk.f32.vlgmr.msra.gmra.mxu0 %vm64_vm0, %v40_v16  ;;  %v227_v6 = vadd.f32 %v589_v2, %v226_v5  ;;  %v472_v5 = vld [vmem:[%s1009_s7 + $0x10] sm:$0xff] }
  0x12   :  { %559 = vmatmul.msk.f32.vlgmr.msra.gmra.mxu1 %vm64_vm0, %v727_v17 }
  0x13   :  { %v812_v7 = vsel %vm228_vm1, %v589_v2, %v227_v6 }
  0x19   :  { %552 = vmatmul.msk.f32.gmra.mxu0 %vm64_vm0, %v41_v18 }
  0x1a   :  { %560 = vmatmul.msk.f32.gmra.mxu1 %vm64_vm0, %v738_v19 }
  0x21   :  { %553 = vmatmul.msk.f32.gmra.mxu0 %vm64_vm0, %v42_v20 }
  0x22   :  { %561 = vmatmul.msk.f32.gmra.mxu1 %vm64_vm0, %v749_v21 }
  0x29   :  { %554 = vmatmul.msk.f32.gmra.mxu0 %vm64_vm0, %v43_v22 }
  0x2a   :  { %562 = vmatmul.msk.f32.gmra.mxu1 %vm64_vm0, %v760_v23 }
  0x31   :  { %555 = vmatmul.msk.f32.gmra.mxu0 %vm64_vm0, %v44_v24 }
  0x32   :  { %563 = vmatmul.msk.f32.gmra.mxu1 %vm64_vm0, %v771_v25 }
  0x39   :  { %556 = vmatmul.msk.f32.gmra.mxu0 %vm64_vm0, %v45_v26 }
  0x3a   :  { %564 = vmatmul.msk.f32.gmra.mxu1 %vm64_vm0, %v782_v27 }
  0x41   :  { %557 = vmatmul.msk.f32.gmra.mxu0 %vm64_vm0, %v46_v28 }
  0x42   :  { %565 = vmatmul.msk.f32.gmra.mxu1 %vm64_vm0, %v793_v29 }
  0x49   :  { %558 = vmatmul.msk.f32.gmra.mxu0 %vm64_vm0, %v47_v30 }
  0x4a   :  { %566 = vmatmul.msk.f32.gmra.mxu1 %vm64_vm0, %v804_v31 }
  0x8e   :  { %v106_v33 = vpop.f32.mrf.mxu0 }
  0x8f   :  { %v171_v34 = vpop.f32.mrf.mxu1 }
  0x90   :  { %v172_v35 = vadd.f32 %v171_v34, %v106_v33 }
  0x92   :  { %v199_v36 = vadd.f32 %v584_v32, %v172_v35 }
  0x94   :  { %207 = vadd.xlane.f32.xlu0 %v199_v36 }
  0x96   :  { %v109_v37 = vpop.f32.mrf.mxu0 }
  0x97   :  { %v174_v38 = vpop.f32.mrf.mxu1 }
  0x98   :  { %v175_v39 = vadd.f32 %v174_v38, %v109_v37 }
  0x9a   :  { %v200_v40 = vadd.f32 %v584_v32, %v175_v39 }
  0x9c   :  { %209 = vadd.xlane.f32.xlu0 %v200_v40 }
  0x9e   :  { %v112_v41 = vpop.f32.mrf.mxu0 }
  0x9f   :  { %v177_v42 = vpop.f32.mrf.mxu1 }
  0xa0   :  { %v178_v43 = vadd.f32 %v177_v42, %v112_v41 }
  0xa2   :  { %v201_v44 = vadd.f32 %v584_v32, %v178_v43 }
  0xa4   :  { %211 = vadd.xlane.f32.xlu1 %v201_v44 }
  0xa6   :  { %v115_v45 = vpop.f32.mrf.mxu0 }
  0xa7   :  { %v180_v46 = vpop.f32.mrf.mxu1 }
  0xa8   :  { %v181_v47 = vadd.f32 %v180_v46, %v115_v45 }
  0xaa   :  { %v202_v48 = vadd.f32 %v584_v32, %v181_v47 }
  0xac   :  { %213 = vadd.xlane.f32.xlu2 %v202_v48 }
  0xae   :  { %v118_v49 = vpop.f32.mrf.mxu0 }
  0xaf   :  { %v183_v50 = vpop.f32.mrf.mxu1 }
  0xb0   :  { %v184_v51 = vadd.f32 %v183_v50, %v118_v49  ;;  %v484_v49 = vld [vmem:[%s1009_s7 + $0x70] sm:$0xff]  ;;  %v483_v50 = vld [vmem:[%s1009_s7 + $0x68] sm:$0xff] }
  0xb2   :  { %v203_v52 = vadd.f32 %v584_v32, %v184_v51  ;;  %v482_v51 = vld [vmem:[%s1009_s7 + $0x60] sm:$0xff] }
  0xb4   :  { %215 = vadd.xlane.f32.xlu0 %v203_v52 }
  0xb6   :  { %v121_v53 = vpop.f32.mrf.mxu0 }
  0xb7   :  { %v186_v54 = vpop.f32.mrf.mxu1 }
  0xb8   :  { %v187_v55 = vadd.f32 %v186_v54, %v121_v53  ;;  %v480_v53 = vld [vmem:[%s1009_s7 + $0x50] sm:$0xff]  ;;  %v479_v54 = vld [vmem:[%s1009_s7 + $0x48] sm:$0xff] }
  0xba   :  { %v204_v56 = vadd.f32 %v584_v32, %v187_v55 }
  0xbc   :  { %217 = vadd.xlane.f32.xlu1 %v204_v56 }
  0xbe   :  { %v124_v57 = vpop.f32.mrf.mxu0 }
  0xbf   :  { %v189_v58 = vpop.f32.mrf.mxu1 }
  0xc0   :  { %v190_v59 = vadd.f32 %v189_v58, %v124_v57  ;;  %v477_v58 = vld [vmem:[%s1009_s7 + $0x38] sm:$0xff] }
  0xc2   :  { %v205_v60 = vadd.f32 %v584_v32, %v190_v59 }
  0xc4   :  { %219 = vadd.xlane.f32.xlu2 %v205_v60 }
  0xc6   :  { %v127_v61 = vpop.f32.mrf.mxu0 }
  0xc7   :  { %v192_v62 = vpop.f32.mrf.mxu1 }
  0xc8   :  { %v193_v63 = vadd.f32 %v192_v62, %v127_v61  ;;  %v475_v61 = vld [vmem:[%s1009_s7 + $0x28] sm:$0xff] }
  0xca   :  { %v206_v0 = vadd.f32 %v584_v32, %v193_v63  ;;  %v474_v63 = vld [vmem:[%s1009_s7 + $0x20] sm:$0xff] }
  0xcc   :  { %221 = vadd.xlane.f32.xlu1 %v206_v0 }
 0x107   :  { %v208_v8 = vpop.xlane.xlu0 %207 }
 0x108   :  { %v230_v9 = vmul.f32 %v812_v7, %v208_v8  ;;  %v471_v8 = vld [vmem:[%s1009_s7 + $0x8] sm:$0xff] }
 0x10a   :  { %v815_v10 = vsub.f32 %v199_v36, %v230_v9 }
 0x10c   :  { %v246_v11 = vmul.f32 %v815_v10, %v815_v10 }
 0x10e   :  { %254 = vadd.xlane.f32.xlu2 %v246_v11 }
 0x10f   :  { %v210_v12 = vpop.xlane.xlu0 %209 }
 0x110   :  { %v231_v13 = vmul.f32 %v812_v7, %v210_v12 }
 0x112   :  { %v820_v14 = vsub.f32 %v200_v40, %v231_v13  ;;  %v470_v13 = vld [vmem:[%s1009_s7] sm:$0xff] }
 0x114   :  { %v247_v15 = vmul.f32 %v820_v14, %v820_v14 }
 0x116   :  { %256 = vadd.xlane.f32.xlu0 %v247_v15 }
 0x117   :  { %v212_v16 = vpop.xlane.xlu1 %211 }
 0x118   :  { %v232_v18 = vmul.f32 %v812_v7, %v212_v16 }
 0x11a   :  { %v825_v20 = vsub.f32 %v201_v44, %v232_v18 }
 0x11c   :  { %v248_v22 = vmul.f32 %v825_v20, %v825_v20 }
 0x11e   :  { %258 = vadd.xlane.f32.xlu1 %v248_v22 }
 0x11f   :  { %v214_v24 = vpop.xlane.xlu2 %213 }
 0x120   :  { %v233_v26 = vmul.f32 %v812_v7, %v214_v24 }
 0x122   :  { %v830_v28 = vsub.f32 %v202_v48, %v233_v26  ;;  %v485_v48 = vld [vmem:[%s1009_s7 + $0x78] sm:$0xff]  ;;  %v908_v26 = vld [vmem:[%s1006_s5] ss:$0 sm:$0xff] }
 0x123   :  { %490 = vmatpush.msra.mxu2 %v485_v48  ;;  %567 = vmatpush.msra.mxu3 %v485_v48 }
 0x124   :  { %v249_v30 = vmul.f32 %v830_v28, %v830_v28 }
 0x125   :  { %491 = vmatpush.msra.mxu2 %v484_v49  ;;  %568 = vmatpush.msra.mxu3 %v484_v49 }
 0x126   :  { %260 = vadd.xlane.f32.xlu0 %v249_v30 }
 0x127   :  { %v216_v34 = vpop.xlane.xlu0 %215  ;;  %492 = vmatpush.msra.mxu2 %v483_v50  ;;  %569 = vmatpush.msra.mxu3 %v483_v50 }
 0x128   :  { %v234_v36 = vmul.f32 %v812_v7, %v216_v34 }
 0x129   :  { %493 = vmatpush.msra.mxu2 %v482_v51  ;;  %570 = vmatpush.msra.mxu3 %v482_v51 }
 0x12a   :  { %v840_v39 = vsub.f32 %v203_v52, %v234_v36  ;;  %v481_v52 = vld [vmem:[%s1009_s7 + $0x58] sm:$0xff] }
 0x12b   :  { %494 = vmatpush.msra.mxu2 %v481_v52  ;;  %571 = vmatpush.msra.mxu3 %v481_v52 }
 0x12c   :  { %v250_v43 = vmul.f32 %v840_v39, %v840_v39 }
 0x12d   :  { %495 = vmatpush.msra.mxu2 %v480_v53  ;;  %572 = vmatpush.msra.mxu3 %v480_v53 }
 0x12f   :  { %v218_v32 = vpop.xlane.xlu1 %217  ;;  %496 = vmatpush.msra.mxu2 %v479_v54  ;;  %573 = vmatpush.msra.mxu3 %v479_v54 }
 0x130   :  { %v235_v33 = vmul.f32 %v812_v7, %v218_v32 }
 0x132   :  { %v835_v35 = vsub.f32 %v204_v56, %v235_v33  ;;  %v478_v56 = vld [vmem:[%s1009_s7 + $0x40] sm:$0xff] }
 0x133   :  { %497 = vmatpush.msra.mxu2 %v478_v56  ;;  %574 = vmatpush.msra.mxu3 %v478_v56  ;;  %v913_v33 = vld [vmem:[%s1007_s6] ss:$0 sm:$0xff] }
 0x134   :  { %v251_v37 = vmul.f32 %v835_v35, %v835_v35 }
 0x135   :  { %498 = vmatpush.msra.mxu2 %v477_v58  ;;  %575 = vmatpush.msra.mxu3 %v477_v58 }
 0x136   :  { %264 = vadd.xlane.f32.xlu2 %v251_v37 }
 0x137   :  { %v220_v38 = vpop.xlane.xlu2 %219 }
 0x138   :  { %v236_v40 = vmul.f32 %v812_v7, %v220_v38 }
 0x13a   :  { %v843_v41 = vsub.f32 %v205_v60, %v236_v40  ;;  %v476_v60 = vld [vmem:[%s1009_s7 + $0x30] sm:$0xff] }
 0x13b   :  { %499 = vmatpush.msra.mxu2 %v476_v60  ;;  %576 = vmatpush.msra.mxu3 %v476_v60 }
 0x13c   :  { %v252_v42 = vmul.f32 %v843_v41, %v843_v41 }
 0x13d   :  { %500 = vmatpush.msra.mxu2 %v475_v61  ;;  %577 = vmatpush.msra.mxu3 %v475_v61 }
 0x13e   :  { %266 = vadd.xlane.f32.xlu1 %v252_v42  ;;  %262 = vadd.xlane.f32.xlu2 %v250_v43 }
 0x13f   :  { %v222_v44 = vpop.xlane.xlu1 %221  ;;  %501 = vmatpush.msra.mxu2 %v474_v63  ;;  %578 = vmatpush.msra.mxu3 %v474_v63 }
 0x140   :  { %v237_v45 = vmul.f32 %v812_v7, %v222_v44 }
 0x141   :  { %502 = vmatpush.msra.mxu2 %v473_v1  ;;  %579 = vmatpush.msra.mxu3 %v473_v1 }
 0x142   :  { %v850_v46 = vsub.f32 %v206_v0, %v237_v45 }
 0x143   :  { %503 = vmatpush.msra.mxu2 %v472_v5  ;;  %580 = vmatpush.msra.mxu3 %v472_v5 }
 0x144   :  { %v253_v47 = vmul.f32 %v850_v46, %v850_v46 }
 0x145   :  { %504 = vmatpush.msra.mxu2 %v471_v8  ;;  %581 = vmatpush.msra.mxu3 %v471_v8 }
 0x146   :  { %268 = vadd.xlane.f32.xlu0 %v253_v47 }
 0x147   :  { %505 = vmatpush.msra.mxu2 %v470_v13  ;;  %582 = vmatpush.msra.mxu3 %v470_v13 }
 0x181   :  { %v255_v55 = vpop.xlane.xlu2 %254 }
 0x182   :  { %v270_v57 = vmul.f32 %v255_v55, %v812_v7 }
 0x184   :  { %v278_v59 = vadd.f32 1e-05, %v270_v57 }
 0x186   :  { %590 = vrsqrt.f32 %v278_v59  ;;  %vm292_vm3 = vweird.f32 %v278_v59 }
 0x189   :  { %v257_v62 = vpop.xlane.xlu0 %256 }
 0x18a   :  { %v271_v0 = vmul.f32 %v257_v62, %v812_v7 }
 0x18c   :  { %v591_v2 = vpop.eup %590  ;;  %v279_v3 = vadd.f32 1e-05, %v271_v0 }
 0x18d   :  { %v287_v4 = vmul.f32 %v591_v2, %v278_v59  ;;  %vm293_vm2 = vweird.f32 %v591_v2 }
 0x18e   :  { %592 = vrsqrt.f32 %v279_v3  ;;  %vm294_vm4 = vmor %vm292_vm3, %vm293_vm2  ;;  %vm302_vm6 = vweird.f32 %v279_v3 }
 0x18f   :  { %v288_v6 = vmul.f32 %v591_v2, %v287_v4 }
 0x191   :  { %v289_v9 = vmul.f32 0.5, %v288_v6  ;;  %v259_v11 = vpop.xlane.xlu1 %258 }
 0x192   :  { %v272_v12 = vmul.f32 %v259_v11, %v812_v7 }
 0x193   :  { %v290_v15 = vsub.f32 1.5, %v289_v9 }
 0x194   :  { %v593_v16 = vpop.eup %592  ;;  %v280_v18 = vadd.f32 1e-05, %v272_v12 }
 0x195   :  { %v291_v22 = vmul.f32 %v591_v2, %v290_v15  ;;  %v297_v24 = vmul.f32 %v593_v16, %v279_v3  ;;  %vm303_vm5 = vweird.f32 %v593_v16 }
 0x196   :  { %594 = vrsqrt.f32 %v280_v18  ;;  %vm304_vm7 = vmor %vm302_vm6, %vm303_vm5  ;;  %vm312_vm9 = vweird.f32 %v280_v18 }
 0x197   :  { %v295_v30 = vsel %vm294_vm4, %v591_v2, %v291_v22  ;;  %v298_v32 = vmul.f32 %v593_v16, %v297_v24 }
 0x198   :  { %v366_v34 = vmul.f32 %v295_v30, %v815_v10 }
 0x199   :  { %v299_v36 = vmul.f32 0.5, %v298_v32  ;;  %v261_v37 = vpop.xlane.xlu0 %260 }
 0x19a   :  { %v378_v38 = vmul.f32 %v908_v26, %v366_v34  ;;  %v273_v40 = vmul.f32 %v261_v37, %v812_v7 }
 0x19b   :  { %v300_v42 = vsub.f32 1.5, %v299_v36 }
 0x19c   :  { %v595_v43 = vpop.eup %594  ;;  %v390_v44 = vadd.f32 %v913_v33, %v378_v38  ;;  %v281_v45 = vadd.f32 1e-05, %v273_v40 }
 0x19d   :  { %v301_v47 = vmul.f32 %v593_v16, %v300_v42  ;;  %v307_v48 = vmul.f32 %v595_v43, %v280_v18  ;;  %vm313_vm8 = vweird.f32 %v595_v43 }
 0x19e   :  { %596 = vrsqrt.f32 %v281_v45  ;;  %v406_v49 = vmul.f32 0.044715, %v390_v44  ;;  %vm314_vm10 = vmor %vm312_vm9, %vm313_vm8  ;;  %vm322_vm12 = vweird.f32 %v281_v45  ;;  %v398_v22 = vmul.f32 0.5, %v390_v44 }
 0x19f   :  { %v305_v50 = vsel %vm304_vm7, %v593_v16, %v301_v47  ;;  %v308_v10 = vmul.f32 %v595_v43, %v307_v48 }
 0x1a0   :  { %v367_v51 = vmul.f32 %v305_v50, %v820_v14  ;;  %v414_v52 = vmul.f32 %v406_v49, %v390_v44 }
 0x1a1   :  { %v309_v53 = vmul.f32 0.5, %v308_v10 }
 0x1a2   :  { %v379_v54 = vmul.f32 %v908_v26, %v367_v51  ;;  %v422_v55 = vmul.f32 %v414_v52, %v390_v44 }
 0x1a3   :  { %v310_v56 = vsub.f32 1.5, %v309_v53 }
 0x1a4   :  { %v597_v57 = vpop.eup %596  ;;  %v391_v58 = vadd.f32 %v913_v33, %v379_v54  ;;  %v430_v59 = vadd.f32 %v422_v55, %v390_v44 }
 0x1a5   :  { %v311_v60 = vmul.f32 %v595_v43, %v310_v56  ;;  %v317_v61 = vmul.f32 %v597_v57, %v281_v45  ;;  %vm323_vm11 = vweird.f32 %v597_v57 }
 0x1a6   :  { %v438_v62 = vmul.f32 0.7978846, %v430_v59  ;;  %v407_v63 = vmul.f32 0.044715, %v391_v58  ;;  %vm324_vm13 = vmor %vm322_vm12, %vm323_vm11  ;;  %v399_v51 = vmul.f32 0.5, %v391_v58 }
 0x1a7   :  { %v315_v0 = vsel %vm314_vm10, %v595_v43, %v311_v60  ;;  %v318_v1 = vmul.f32 %v597_v57, %v317_v61 }
 0x1a8   :  { %v368_v14 = vmul.f32 %v315_v0, %v825_v20  ;;  %598 = vtanh.f32 %v438_v62  ;;  %v415_v2 = vmul.f32 %v407_v63, %v391_v58 }
 0x1a9   :  { %v319_v3 = vmul.f32 0.5, %v318_v1  ;;  %v265_v4 = vpop.xlane.xlu2 %264 }
 0x1aa   :  { %v380_v5 = vmul.f32 %v908_v26, %v368_v14  ;;  %v275_v6 = vmul.f32 %v265_v4, %v812_v7  ;;  %v423_v8 = vmul.f32 %v415_v2, %v391_v58 }
 0x1ab   :  { %v320_v9 = vsub.f32 1.5, %v319_v3 }
 0x1ac   :  { %v926_v11 = vadd.f32 %v913_v33, %v380_v5  ;;  %v283_v12 = vadd.f32 1e-05, %v275_v6  ;;  %v431_v13 = vadd.f32 %v423_v8, %v391_v58 }
 0x1ad   :  { %v321_v15 = vmul.f32 %v597_v57, %v320_v9 }
 0x1ae   :  { %v599_v16 = vpop.eup %598  ;;  %600 = vrsqrt.f32 %v283_v12  ;;  %v439_v20 = vmul.f32 0.7978846, %v431_v13  ;;  %v408_v30 = vmul.f32 0.044715, %v926_v11  ;;  %vm342_vm15 = vweird.f32 %v283_v12 }
 0x1af   :  { %v325_v18 = vsel %vm324_vm13, %v597_v57, %v321_v15  ;;  %v454_v24 = vadd.f32 1.0, %v599_v16  ;;  %v400_v13 = vmul.f32 0.5, %v926_v11 }
 0x1b0   :  { %v369_v32 = vmul.f32 %v325_v18, %v830_v28  ;;  %602 = vtanh.f32 %v439_v20  ;;  %v416_v38 = vmul.f32 %v408_v30, %v926_v11 }
 0x1b1   :  { %v267_v34 = vpop.xlane.xlu1 %266  ;;  %v263_v36 = vpop.xlane.xlu2 %262  ;;  %v462_v37 = vmul.f32 %v454_v24, %v398_v22 }
 0x1b2   :  { %v381_v40 = vmul.f32 %v908_v26, %v369_v32  ;;  %v276_v42 = vmul.f32 %v267_v34, %v812_v7  ;;  %v274_v43 = vmul.f32 %v263_v36, %v812_v7  ;;  %v424_v44 = vmul.f32 %v416_v38, %v926_v11 }
 0x1b3   :  { %506 = vmatmul.f32.vlgmr.msra.gmra.mxu2 %v462_v37 }
 0x1b4   :  { %v601_v45 = vpop.eup %600  ;;  %v936_v47 = vadd.f32 %v913_v33, %v381_v40  ;;  %v284_v28 = vadd.f32 1e-05, %v276_v42  ;;  %v282_v48 = vadd.f32 1e-05, %v274_v43  ;;  %v432_v50 = vadd.f32 %v424_v44, %v926_v11 }
 0x1b5   :  { %v337_v49 = vmul.f32 %v601_v45, %v283_v12  ;;  %vm343_vm14 = vweird.f32 %v601_v45 }
 0x1b6   :  { %v603_v10 = vpop.eup %602  ;;  %604 = vrsqrt.f32 %v284_v28  ;;  %v440_v54 = vmul.f32 0.7978846, %v432_v50  ;;  %v409_v55 = vmul.f32 0.044715, %v936_v47  ;;  %vm344_vm1 = vmor %vm342_vm15, %vm343_vm14  ;;  %vm352_vm4 = vweird.f32 %v284_v28 }
 0x1b7   :  { %v338_v52 = vmul.f32 %v601_v45, %v337_v49  ;;  %606 = vrsqrt.f32 %v282_v48  ;;  %v455_v53 = vadd.f32 1.0, %v603_v10  ;;  %vm332_vm6 = vweird.f32 %v282_v48 }
 0x1b8   :  { %608 = vtanh.f32 %v440_v54  ;;  %v417_v61 = vmul.f32 %v409_v55, %v936_v47 }
 0x1b9   :  { %v339_v56 = vmul.f32 0.5, %v338_v52  ;;  %v269_v57 = vpop.xlane.xlu0 %268  ;;  %v463_v59 = vmul.f32 %v455_v53, %v399_v51 }
 0x1ba   :  { %v277_v60 = vmul.f32 %v269_v57, %v812_v7  ;;  %v425_v58 = vmul.f32 %v417_v61, %v936_v47 }
 0x1bb   :  { %v340_v62 = vsub.f32 1.5, %v339_v56  ;;  %509 = vmatmul.f32.gmra.mxu2 %v463_v59 }
 0x1bc   :  { %v605_v63 = vpop.eup %604  ;;  %v285_v0 = vadd.f32 1e-05, %v277_v60  ;;  %v433_v7 = vadd.f32 %v425_v58, %v936_v47 }
 0x1bd   :  { %v607_v1 = vpop.eup %606  ;;  %v341_v14 = vmul.f32 %v601_v45, %v340_v62  ;;  %v347_v2 = vmul.f32 %v605_v63, %v284_v28  ;;  %vm353_vm2 = vweird.f32 %v605_v63  ;;  %v401_v28 = vmul.f32 0.5, %v936_v47 }
 0x1be   :  { %v327_v3 = vmul.f32 %v607_v1, %v282_v48  ;;  %610 = vrsqrt.f32 %v285_v0  ;;  %v609_v4 = vpop.eup %608  ;;  %v441_v20 = vmul.f32 0.7978846, %v433_v7  ;;  %vm333_vm3 = vweird.f32 %v607_v1  ;;  %vm354_vm5 = vmor %vm352_vm4, %vm353_vm2 }
 0x1bf   :  { %v345_v5 = vsel %vm344_vm1, %v601_v45, %v341_v14  ;;  %v348_v6 = vmul.f32 %v605_v63, %v347_v2  ;;  %v456_v15 = vadd.f32 1.0, %v609_v4  ;;  %vm334_vm7 = vmor %vm332_vm6, %vm333_vm3  ;;  %vm362_vm9 = vweird.f32 %v285_v0 }
 0x1c0   :  { %v371_v8 = vmul.f32 %v345_v5, %v835_v35  ;;  %v328_v9 = vmul.f32 %v607_v1, %v327_v3  ;;  %612 = vtanh.f32 %v441_v20 }
 0x1c1   :  { %v349_v16 = vmul.f32 0.5, %v348_v6  ;;  %v464_v22 = vmul.f32 %v456_v15, %v400_v13 }
 0x1c2   :  { %v383_v18 = vmul.f32 %v908_v26, %v371_v8  ;;  %v329_v12 = vmul.f32 0.5, %v328_v9 }
 0x1c3   :  { %v350_v24 = vsub.f32 1.5, %v349_v16  ;;  %512 = vmatmul.f32.gmra.mxu2 %v464_v22 }
 0x1c4   :  { %v611_v30 = vpop.eup %610  ;;  %v395_v32 = vadd.f32 %v913_v33, %v383_v18  ;;  %v330_v34 = vsub.f32 1.5, %v329_v12 }
 0x1c5   :  { %v351_v35 = vmul.f32 %v605_v63, %v350_v24  ;;  %v357_v36 = vmul.f32 %v611_v30, %v285_v0  ;;  %vm363_vm8 = vweird.f32 %v611_v30 }
 0x1c6   :  { %v331_v11 = vmul.f32 %v607_v1, %v330_v34  ;;  %v411_v37 = vmul.f32 0.044715, %v395_v32  ;;  %v613_v45 = vpop.eup %612  ;;  %vm364_vm10 = vmor %vm362_vm9, %vm363_vm8  ;;  %v403_v7 = vmul.f32 0.5, %v395_v32 }
 0x1c7   :  { %v355_v38 = vsel %vm354_vm5, %v605_v63, %v351_v35  ;;  %v358_v40 = vmul.f32 %v611_v30, %v357_v36  ;;  %v457_v51 = vadd.f32 1.0, %v613_v45 }
 0x1c8   :  { %v372_v42 = vmul.f32 %v355_v38, %v843_v41  ;;  %v335_v43 = vsel %vm334_vm7, %v607_v1, %v331_v11  ;;  %v419_v44 = vmul.f32 %v411_v37, %v395_v32  ;;  %v587_v37 = vld [vmem:[%s1008_s8] ss:$0 sm:$0xff] }
 0x1c9   :  { %v370_v49 = vmul.f32 %v335_v43, %v840_v39  ;;  %v359_v50 = vmul.f32 0.5, %v358_v40  ;;  %v465_v55 = vmul.f32 %v457_v51, %v401_v28 }
 0x1ca   :  { %v384_v10 = vmul.f32 %v908_v26, %v372_v42  ;;  %v427_v52 = vmul.f32 %v419_v44, %v395_v32 }
 0x1cb   :  { %v382_v48 = vmul.f32 %v908_v26, %v370_v49  ;;  %v360_v53 = vsub.f32 1.5, %v359_v50  ;;  %515 = vmatmul.f32.gmra.mxu2 %v465_v55 }
 0x1cc   :  { %v396_v54 = vadd.f32 %v913_v33, %v384_v10  ;;  %v435_v41 = vadd.f32 %v427_v52, %v395_v32 }
 0x1cd   :  { %v394_v56 = vadd.f32 %v913_v33, %v382_v48  ;;  %v361_v57 = vmul.f32 %v611_v30, %v360_v53 }
 0x1ce   :  { %v443_v39 = vmul.f32 0.7978846, %v435_v41  ;;  %v412_v59 = vmul.f32 0.044715, %v396_v54  ;;  %v404_v12 = vmul.f32 0.5, %v396_v54 }
 0x1cf   :  { %v365_v60 = vsel %vm364_vm10, %v611_v30, %v361_v57  ;;  %v410_v47 = vmul.f32 0.044715, %v394_v56  ;;  %v402_v22 = vmul.f32 0.5, %v394_v56 }
 0x1d0   :  { %v373_v61 = vmul.f32 %v365_v60, %v850_v46  ;;  %614 = vtanh.f32 %v443_v39  ;;  %v420_v62 = vmul.f32 %v412_v59, %v396_v54 }
 0x1d1   :  { %v418_v63 = vmul.f32 %v410_v47, %v394_v56 }
 0x1d2   :  { %v385_v58 = vmul.f32 %v908_v26, %v373_v61  ;;  %v428_v1 = vmul.f32 %v420_v62, %v396_v54 }
 0x1d3   :  { %v426_v14 = vmul.f32 %v418_v63, %v394_v56 }
 0x1d4   :  { %v397_v2 = vadd.f32 %v913_v33, %v385_v58  ;;  %v436_v3 = vadd.f32 %v428_v1, %v396_v54 }
 0x1d5   :  { %v434_v4 = vadd.f32 %v426_v14, %v394_v56 }
 0x1d6   :  { %v615_v0 = vpop.eup %614  ;;  %v444_v5 = vmul.f32 0.7978846, %v436_v3  ;;  %v413_v6 = vmul.f32 0.044715, %v397_v2  ;;  %v405_v35 = vmul.f32 0.5, %v397_v2 }
 0x1d7   :  { %v459_v8 = vadd.f32 1.0, %v615_v0  ;;  %v442_v9 = vmul.f32 0.7978846, %v434_v4 }
 0x1d8   :  { %616 = vtanh.f32 %v444_v5  ;;  %v421_v13 = vmul.f32 %v413_v6, %v397_v2 }
 0x1d9   :  { %v467_v46 = vmul.f32 %v459_v8, %v403_v7  ;;  %618 = vtanh.f32 %v442_v9 }
 0x1da   :  { %v429_v15 = vmul.f32 %v421_v13, %v397_v2 }
 0x1db   :  { %521 = vmatmul.f32.vlgmr.msra.gmra.mxu3 %v467_v46 }
 0x1dc   :  { %v437_v16 = vadd.f32 %v429_v15, %v397_v2 }
 0x1de   :  { %v617_v26 = vpop.eup %616  ;;  %v445_v20 = vmul.f32 0.7978846, %v437_v16 }
 0x1df   :  { %v619_v18 = vpop.eup %618  ;;  %v460_v33 = vadd.f32 1.0, %v617_v26 }
 0x1e0   :  { %v458_v24 = vadd.f32 1.0, %v619_v18  ;;  %620 = vtanh.f32 %v445_v20 }
 0x1e1   :  { %v468_v30 = vmul.f32 %v460_v33, %v404_v12 }
 0x1e2   :  { %v466_v34 = vmul.f32 %v458_v24, %v402_v22 }
 0x1e3   :  { %524 = vmatmul.f32.gmra.mxu3 %v468_v30 }
 0x1e4   :  { %518 = vmatmul.f32.gmra.mxu2 %v466_v34 }
 0x1e6   :  { %v621_v32 = vpop.eup %620 }
 0x1e7   :  { %v461_v36 = vadd.f32 1.0, %v621_v32 }
 0x1e9   :  { %v469_v11 = vmul.f32 %v461_v36, %v405_v35 }
 0x1eb   :  { %527 = vmatmul.f32.gmra.mxu3 %v469_v11 }
 0x236   :  { %v507_v38 = vpop.f32.mrf.mxu2 }
 0x237   :  { %v508_v40 = vadd.f32 %v587_v37, %v507_v38 }
 0x239   :  { %v531_v42 = vadd.f32 %v508_v40, %v727_v17 }
 0x23b   :  { %539 = vst.msk [vmem:[%s1010_s9] sm:$0xff] %vm64_vm0, %v531_v42 }
 0x23e   :  { %v510_v43 = vpop.f32.mrf.mxu2 }
 0x23f   :  { %v511_v44 = vadd.f32 %v587_v37, %v510_v43 }
 0x241   :  { %v532_v45 = vadd.f32 %v511_v44, %v738_v19 }
 0x243   :  { %540 = vst.msk [vmem:[%s1010_s9 + $0x8] sm:$0xff] %vm64_vm0, %v532_v45 }
 0x246   :  { %v513_v49 = vpop.f32.mrf.mxu2 }
 0x247   :  { %v514_v50 = vadd.f32 %v587_v37, %v513_v49 }
 0x249   :  { %v533_v10 = vadd.f32 %v514_v50, %v749_v21 }
 0x24b   :  { %541 = vst.msk [vmem:[%s1010_s9 + $0x10] sm:$0xff] %vm64_vm0, %v533_v10 }
 0x24e   :  { %v516_v17 = vpop.f32.mrf.mxu2 }
 0x24f   :  { %v517_v28 = vadd.f32 %v587_v37, %v516_v17 }
 0x251   :  { %v534_v51 = vadd.f32 %v517_v28, %v760_v23 }
 0x253   :  { %542 = vst.msk [vmem:[%s1010_s9 + $0x18] sm:$0xff] %vm64_vm0, %v534_v51 }
 0x25e   :  { %v522_v19 = vpop.f32.mrf.mxu3 }
 0x25f   :  { %v523_v52 = vadd.f32 %v587_v37, %v522_v19 }
 0x261   :  { %v536_v48 = vadd.f32 %v523_v52, %v782_v27 }
 0x263   :  { %544 = vst.msk [vmem:[%s1010_s9 + $0x28] sm:$0xff] %vm64_vm0, %v536_v48 }
 0x266   :  { %v525_v21 = vpop.f32.mrf.mxu3 }
 0x267   :  { %v519_v53 = vpop.f32.mrf.mxu2  ;;  %v526_v54 = vadd.f32 %v587_v37, %v525_v21 }
 0x268   :  { %v520_v55 = vadd.f32 %v587_v37, %v519_v53 }
 0x269   :  { %v537_v23 = vadd.f32 %v526_v54, %v793_v29 }
 0x26a   :  { %v535_v41 = vadd.f32 %v520_v55, %v771_v25 }
 0x26b   :  { %545 = vst.msk [vmem:[%s1010_s9 + $0x30] sm:$0xff] %vm64_vm0, %v537_v23 }
 0x26c   :  { %543 = vst.msk [vmem:[%s1010_s9 + $0x20] sm:$0xff] %vm64_vm0, %v535_v41 }
 0x26e   :  { %v528_v27 = vpop.f32.mrf.mxu3 }
 0x26f   :  { %v529_v56 = vadd.f32 %v587_v37, %v528_v27 }
 0x271   :  { %v538_v57 = vadd.f32 %v529_v56, %v804_v31 }
 0x273   :  { %546 = vst.msk [vmem:[%s1010_s9 + $0x38] sm:$0xff] %vm64_vm0, %v538_v57 }

// kernel: transformer_layer_forward.6
= control target key start
LH: loop header
LB: loop body
LE: loop exit
PB: predicated region body
PF: predicated region fallthrough
CT: control target
= control target key end

     0   :  { %s1317_s30 = smov 0   ;;  %s1586_s0 = inlined_call_operand.vmem [shape: f32[2,16,64], index: 0, kind: input, shape index: {}]   ;;  %s1587_s1 = inlined_call_operand.vmem [shape: f32[2,16,64], index: 1, kind: input, shape index: {}]   ;;  %s1588_s2 = inlined_call_operand.vmem [shape: f32[64,64], index: 2, kind: input, shape index: {}]   ;;  %s1589_s3 = inlined_call_operand.vmem [shape: f32[1,64], index: 3, kind: input, shape index: {}]   ;;  %s1590_s4 = inlined_call_operand.vmem [shape: f32[64,64], index: 4, kind: input, shape index: {}]   ;;  %s1591_s5 = inlined_call_operand.vmem [shape: f32[1,64], index: 5, kind: input, shape index: {}]   ;;  %s1592_s6 = inlined_call_operand.vmem [shape: f32[64,64], index: 6, kind: input, shape index: {}]   ;;  %s1593_s7 = inlined_call_operand.vmem [shape: f32[1,64], index: 7, kind: input, shape index: {}]   ;;  %s1594_s8 = inlined_call_operand.vmem [shape: f32[2,16,64], index: 8, kind: output, shape index: {0}]   ;;  %s1595_s9 = inlined_call_operand.vmem [shape: f32[2,16,64], index: 9, kind: output, shape index: {1}]  }
   0x1 LB: > { %s1143_s10 = sadd.s32 4294967295, %s1263_s30   ;;  %p1147_p0 = scmp.ge.s32.totalorder %s1263_s30, 1  ;;  %s1263_s30 = sphi %s1317_s30, %s20_s30  }
   0x2   : > { %p300_p1 = scmp.lt.s32.totalorder %s1263_s30, 3 }
   0x4   : > { %p301_p2 = pnand %p1147_p0, %p300_p1 }
   0x5   : > { %p346_p3 = scmp.lt.s32.totalorder (!%p301_p2), %s1143_s10, 1  ;;  %s1265_s14 = smov (!%p301_p2), 96  }
   0x6   : > { %304 = sbr.rel (%p301_p2) target bundleno = 1096 (0x448), region = 52  ;;  %s1266_s12 = smov (!%p301_p2), 32  }
   0xb   : > { %v377_v0 = vld [vmem:[%s1588_s2 + $0x38] sm:$0xff]  ;;  %v376_v1 = vld [vmem:[%s1588_s2 + $0x30] sm:$0xff]  ;;  %v375_v2 = vld [vmem:[%s1588_s2 + $0x28] sm:$0xff]  ;;  %s1597_s10 = smov (!%p346_p3, %s1143_s10), 1  ;;  %vm391_vm0 = vcmask 523264   ;;  %vm503_vm1 = vcmask 261120  }
   0xc   : > { %406 = vmatpush.msra.mxu0 %v377_v0  ;;  %435 = vmatpush.msra.mxu1 %v377_v0  ;;  %v386_v3 = vld [vmem:[%s1590_s4 + $0x38] sm:$0xff]  ;;  %v385_v4 = vld [vmem:[%s1590_s4 + $0x30] sm:$0xff]  ;;  %v374_v5 = vld [vmem:[%s1588_s2 + $0x20] sm:$0xff]  ;;  %s1349_s27 = sshll.u32 %s1597_s10, 4  ;;  %vm562_vm2 = vcmask 130048  }
   0xd   : > { %461 = vmatpush.msra.mxu2 %v386_v3  ;;  %484 = vmatpush.msra.mxu3 %v386_v3  ;;  %v384_v6 = vld [vmem:[%s1590_s4 + $0x28] sm:$0xff]  ;;  %v373_v7 = vld [vmem:[%s1588_s2 + $0x18] sm:$0xff]  ;;  %v383_v8 = vld [vmem:[%s1590_s4 + $0x20] sm:$0xff]  ;;  %s350_s18 = scalar_lea.vmem %s1586_s0, %s1349_s27  ;;  %s355_s21 = scalar_lea.vmem %s1587_s1, %s1349_s27 }
   0xe   : > { %407 = vmatpush.msra.mxu0 %v376_v1  ;;  %436 = vmatpush.msra.mxu1 %v376_v1  ;;  %v372_v9 = vld [vmem:[%s1588_s2 + $0x10] sm:$0xff]  ;;  %v382_v10 = vld [vmem:[%s1590_s4 + $0x18] sm:$0xff]  ;;  %v371_v11 = vld [vmem:[%s1588_s2 + $0x8] sm:$0xff] }
   0xf   : > { %462 = vmatpush.msra.mxu2 %v385_v4  ;;  %485 = vmatpush.msra.mxu3 %v385_v4  ;;  %v381_v12 = vld [vmem:[%s1590_s4 + $0x10] sm:$0xff]  ;;  %v370_v13 = vld [vmem:[%s1588_s2] sm:$0xff]  ;;  %v367_v16 = vld [vmem:[%s350_s18 + $0x8] sm:$0xff] }
  0x10   : > { %408 = vmatpush.msra.mxu0 %v375_v2  ;;  %437 = vmatpush.msra.mxu1 %v375_v2  ;;  %v366_v14 = vld [vmem:[%s350_s18] sm:$0xff]  ;;  %v369_v17 = vld [vmem:[%s355_s21 + $0x8] sm:$0xff]  ;;  %s360_s18 = scalar_lea.vmem %s1594_s8, %s1349_s27 }
  0x11   : > { %463 = vmatpush.msra.mxu2 %v384_v6  ;;  %486 = vmatpush.msra.mxu3 %v384_v6  ;;  %v368_v15 = vld [vmem:[%s355_s21] sm:$0xff]  ;;  %v380_v18 = vld [vmem:[%s1590_s4 + $0x8] sm:$0xff]  ;;  %s365_s21 = scalar_lea.vmem %s1595_s9, %s1349_s27 }
  0x12   : > { %409 = vmatpush.msra.mxu0 %v374_v5  ;;  %438 = vmatpush.msra.mxu1 %v374_v5  ;;  %v379_v19 = vld [vmem:[%s1590_s4] sm:$0xff] }
  0x13   : > { %464 = vmatpush.msra.mxu2 %v383_v8  ;;  %487 = vmatpush.msra.mxu3 %v383_v8  ;;  %v1222_v20 = vld [vmem:[%s1589_s3] ss:$0 sm:$0xff] }
  0x14   : > { %410 = vmatpush.msra.mxu0 %v373_v7  ;;  %439 = vmatpush.msra.mxu1 %v373_v7  ;;  %v1223_v33 = vld [vmem:[%s1591_s5] ss:$0 sm:$0xff] }
  0x15   : > { %465 = vmatpush.msra.mxu2 %v382_v10  ;;  %488 = vmatpush.msra.mxu3 %v382_v10 }
  0x16   : > { %411 = vmatpush.msra.mxu0 %v372_v9  ;;  %440 = vmatpush.msra.mxu1 %v372_v9 }
  0x17   : > { %466 = vmatpush.msra.mxu2 %v381_v12  ;;  %489 = vmatpush.msra.mxu3 %v381_v12 }
  0x18   : > { %412 = vmatpush.msra.mxu0 %v371_v11  ;;  %441 = vmatpush.msra.mxu1 %v371_v11 }
  0x19   : > { %467 = vmatpush.msra.mxu2 %v380_v18  ;;  %490 = vmatpush.msra.mxu3 %v380_v18 }
  0x1a   : > { %413 = vmatpush.msra.mxu0 %v370_v13  ;;  %442 = vmatpush.msra.mxu1 %v370_v13 }
  0x1b   : > { %1156 = vmatmul.msk.f32.vlgmr.msra.gmra.mxu0 %vm391_vm0, %v366_v14  ;;  %1158 = vmatmul.msk.f32.vlgmr.msra.gmra.mxu1 %vm391_vm0, %v368_v15 }
  0x1c   : > { %468 = vmatpush.msra.mxu2 %v379_v19  ;;  %491 = vmatpush.msra.mxu3 %v379_v19 }
  0x1d   : > { %1160 = vmatmul.msk.f32.vlgmr.msra.gmra.mxu2 %vm391_vm0, %v366_v14  ;;  %1162 = vmatmul.msk.f32.vlgmr.msra.gmra.mxu3 %vm391_vm0, %v368_v15 }
  0x23   : > { %1157 = vmatmul.msk.f32.gmra.mxu0 %vm391_vm0, %v367_v16  ;;  %1159 = vmatmul.msk.f32.gmra.mxu1 %vm391_vm0, %v369_v17 }
  0x25   : > { %1161 = vmatmul.msk.f32.gmra.mxu2 %vm391_vm0, %v367_v16  ;;  %1163 = vmatmul.msk.f32.gmra.mxu3 %vm391_vm0, %v369_v17 }
  0x98   : > { %v415_v21 = vpop.f32.mrf.mxu0  ;;  %v444_v22 = vpop.f32.mrf.mxu1 }
  0x99   : > { %v416_v23 = vadd.f32 %v1222_v20, %v415_v21  ;;  %v445_v25 = vadd.f32 %v1222_v20, %v444_v22 }
  0x9b   : > { %v499_v24 = vmul.f32 0.4204482, %v416_v23  ;;  %v501_v30 = vmul.f32 0.4204482, %v445_v25 }
  0x9d   : > { %717 = vrot.lane.b32.xlu1 %v499_v24, %s1265_s14 }
  0xa0   : > { %v418_v26 = vpop.f32.mrf.mxu0  ;;  %v447_v27 = vpop.f32.mrf.mxu1 }
  0xa1   : > { %v419_v28 = vadd.f32 %v1222_v20, %v418_v26  ;;  %v448_v29 = vadd.f32 %v1222_v20, %v447_v27  ;;  %v470_v34 = vpop.f32.mrf.mxu2  ;;  %v493_v35 = vpop.f32.mrf.mxu3 }
  0xa2   : > { %v1413_v36 = vadd.f32 %v1223_v33, %v470_v34  ;;  %v1415_v37 = vadd.f32 %v1223_v33, %v493_v35 }
  0xa3   : > { %v500_v31 = vmul.f32 0.4204482, %v419_v28  ;;  %v502_v32 = vmul.f32 0.4204482, %v448_v29 }
  0xa4   : > { %v1217_v38 = vpack.i.bf16 %v1413_v36, %v1415_v37 }
  0xa5   : > { %1164 = vmatpush.xpose.msk.msrb.mxu0 %vm503_vm1, %v502_v32  ;;  %1198 = vmatpush.xpose.msk.msrb.mxu2 %vm503_vm1, %v502_v32 }
  0xa6   : > { %719 = vrot.lane.b32.xlu0 %v500_v31, %s1265_s14  ;;  %1168 = vmatpush.xpose.msk.msrb.mxu1 %vm503_vm1, %v500_v31 }
  0xa7   : > { %1200 = vmatpush.xpose.msk.msrb.mxu3 %vm503_vm1, %v500_v31  ;;  %721 = vrot.lane.b32.xlu1 %v501_v30, %s1265_s14 }
  0xa9   : > { %1165 = vmatpush.xpose.msk.msrb.mxu0 %vm503_vm1, %v501_v30  ;;  %1199 = vmatpush.xpose.msk.msrb.mxu2 %vm503_vm1, %v501_v30  ;;  %v473_v39 = vpop.f32.mrf.mxu2  ;;  %v496_v40 = vpop.f32.mrf.mxu3 }
  0xaa   : > { %1169 = vmatpush.xpose.msk.msrb.mxu1 %vm503_vm1, %v499_v24  ;;  %v1419_v41 = vadd.f32 %v1223_v33, %v473_v39  ;;  %v1421_v42 = vadd.f32 %v1223_v33, %v496_v40 }
  0xab   : > { %1201 = vmatpush.xpose.msk.msrb.mxu3 %vm503_vm1, %v499_v24 }
  0xac   : > { %1166 = vmatmul.msk.f32.vlgmr.msrb.gmra.mxu0 %vm503_vm1, %v499_v24  ;;  %1167 = vmatmul.msk.f32.vlgmr.msrb.gmra.mxu2 %vm503_vm1, %v500_v31  ;;  %v1212_v43 = vpack.i.bf16 %v1419_v41, %v1421_v42 }
  0xad   : > { %1170 = vmatmul.msk.f32.vlgmr.msrb.gmra.mxu1 %vm503_vm1, %v501_v30  ;;  %679 = vmatpush.msra.mxu2 %v1421_v42 }
  0xae   : > { %1171 = vmatmul.msk.f32.vlgmr.msrb.gmra.mxu3 %vm503_vm1, %v502_v32  ;;  %723 = vrot.lane.b32.xlu0 %v502_v32, %s1265_s14 }
  0xaf   : > { %708 = vmatpush.msra.mxu3 %v1419_v41  ;;  %680 = vmatpush.msra.mxu2 %v1415_v37 }
  0xb1   : > { %709 = vmatpush.msra.mxu3 %v1413_v36 }
 0x10f   : > { %v718_v44 = vpop.permute.xlu1 %717 }
 0x118   : > { %v720_v45 = vpop.permute.xlu0 %719 }
 0x119   : > { %1180 = vmatpush.xpose.msk.msra.mxu1 %vm503_vm1, %v720_v45  ;;  %v722_v46 = vpop.permute.xlu1 %721 }
 0x11d   : > { %1181 = vmatpush.xpose.msk.msra.mxu1 %vm503_vm1, %v718_v44 }
 0x120   : > { %v724_v47 = vpop.permute.xlu0 %723  ;;  %1182 = vmatmul.msk.f32.vlgmr.msra.gmra.mxu1 %vm503_vm1, %v722_v46 }
 0x121   : > { %1176 = vmatpush.xpose.msk.msra.mxu0 %vm503_vm1, %v724_v47 }
 0x125   : > { %1177 = vmatpush.xpose.msk.msra.mxu0 %vm503_vm1, %v722_v46 }
 0x128   : > { %1178 = vmatmul.msk.f32.vlgmr.msra.gmra.mxu0 %vm503_vm1, %v718_v44  ;;  %1183 = vmatmul.msk.f32.gmra.mxu1 %vm503_vm1, %v724_v47 }
 0x129   : > { %v533_v48 = vpop.f32.mrf.mxu0 }
 0x12a   : > { %v563_v49 = vsel %vm562_vm2, %v533_v48, -inf  ;;  %v556_v50 = vpop.f32.mrf.mxu1 }
 0x12b   : > { %564 = vmax.xlane.f32.xlu2 %v563_v49  ;;  %v611_v55 = vsel %vm562_vm2, %v556_v50, -inf }
 0x12f   : > { %v536_v51 = vpop.f32.mrf.mxu2 }
 0x130   : > { %1179 = vmatmul.msk.f32.gmra.mxu0 %vm503_vm1, %v720_v45  ;;  %v566_v52 = vsel %vm562_vm2, %v536_v51, -inf }
 0x131   : > { %v559_v53 = vpop.f32.mrf.mxu3  ;;  %567 = vmax.xlane.f32.xlu0 %v566_v52 }
 0x132   : > { %v614_v54 = vsel %vm562_vm2, %v559_v53, -inf }
 0x133   : > { %615 = vmax.xlane.f32.xlu1 %v614_v54  ;;  %612 = vmax.xlane.f32.xlu2 %v611_v55 }
 0x19d   : > { %v773_v0 = vpop.f32.mrf.mxu1 }
 0x19e   : > { %v827_v1 = vsel %vm562_vm2, %v773_v0, -inf  ;;  %v565_v3 = vpop.xlane.xlu2 %564 }
 0x19f   : > { %v569_v8 = vsub.f32 %v533_v48, %v565_v3 }
 0x1a1   : > { %v571_v10 = vmul.f32 1.442695, %v569_v8 }
 0x1a4   : > { %v568_v56 = vpop.xlane.xlu0 %567 }
 0x1a5   : > { %v570_v57 = vsub.f32 %v536_v51, %v568_v56  ;;  %v750_v58 = vpop.f32.mrf.mxu0  ;;  %v776_v12 = vpop.f32.mrf.mxu1 }
 0x1a6   : > { %v616_v59 = vpop.xlane.xlu1 %615  ;;  %v779_v60 = vsel %vm562_vm2, %v750_v58, -inf  ;;  %v613_v11 = vpop.xlane.xlu2 %612  ;;  %v830_v14 = vsel %vm562_vm2, %v776_v12, -inf }
 0x1a7   : > { %v573_v61 = vmul.f32 1.442695, %v570_v57  ;;  %v618_v62 = vsub.f32 %v559_v53, %v616_v59  ;;  %780 = vmax.xlane.f32.xlu2 %v779_v60  ;;  %v617_v13 = vsub.f32 %v556_v50, %v613_v11 }
 0x1a9   : > { %1225 = vpow2.f32 %v573_v61  ;;  %v621_v63 = vmul.f32 1.442695, %v618_v62  ;;  %v619_v15 = vmul.f32 1.442695, %v617_v13 }
 0x1ab   : > { %1227 = vpow2.f32 %v621_v63 }
 0x1ac   : > { %1229 = vpow2.f32 %v571_v10 }
 0x1ad   : > { %v753_v7 = vpop.f32.mrf.mxu0  ;;  %1231 = vpow2.f32 %v619_v15 }
 0x1ae   : > { %v782_v9 = vsel %vm562_vm2, %v753_v7, -inf }
 0x1af   : > { %v1443_v2 = vpop.eup %1225  ;;  %828 = vmax.xlane.f32.xlu2 %v827_v1 }
 0x1b0   : > { %v578_v4 = vsel %vm562_vm2, %v1443_v2, 0.0 }
 0x1b1   : > { %v1447_v5 = vpop.eup %1227  ;;  %579 = vadd.xlane.f32.xlu0 %v578_v4 }
 0x1b2   : > { %v626_v6 = vsel %vm562_vm2, %v1447_v5, 0.0  ;;  %v1453_v16 = vpop.eup %1229 }
 0x1b3   : > { %627 = vadd.xlane.f32.xlu1 %v626_v6  ;;  %v575_v17 = vsel %vm562_vm2, %v1453_v16, 0.0  ;;  %v1457_v18 = vpop.eup %1231 }
 0x1b4   : > { %v623_v19 = vsel %vm562_vm2, %v1457_v18, 0.0 }
 0x1b7   : > { %783 = vmax.xlane.f32.xlu2 %v782_v9 }
 0x1bf   : > { %831 = vmax.xlane.f32.xlu2 %v830_v14 }
 0x1c7   : > { %576 = vadd.xlane.f32.xlu2 %v575_v17 }
 0x1cf   : > { %624 = vadd.xlane.f32.xlu2 %v623_v19 }
 0x21a   : > { %v781_v20 = vpop.xlane.xlu2 %780 }
 0x21b   : > { %v785_v21 = vsub.f32 %v750_v58, %v781_v20 }
 0x21d   : > { %v787_v22 = vmul.f32 1.442695, %v785_v21 }
 0x21f   : > { %1233 = vpow2.f32 %v787_v22 }
 0x222   : > { %v829_v23 = vpop.xlane.xlu2 %828 }
 0x223   : > { %v833_v24 = vsub.f32 %v773_v0, %v829_v23 }
 0x224   : > { %v580_v33 = vpop.xlane.xlu0 %579 }
 0x225   : > { %v1461_v25 = vpop.eup %1233  ;;  %v835_v26 = vmul.f32 1.442695, %v833_v24  ;;  %vm601_vm8 = vweird.f32 %v580_v33  ;;  %v605_v8 = vand.u32 2147483647, %v580_v33 }
 0x226   : > { %v791_v27 = vsel %vm562_vm2, %v1461_v25, 0.0  ;;  %v1473_v45 = vpop.xlane.xlu1 %627 }
 0x227   : > { %1235 = vpow2.f32 %v835_v26  ;;  %792 = vadd.xlane.f32.xlu2 %v791_v27  ;;  %vm606_vm12 = vcmp.eq.f32.partialorder %v605_v8, 8.507059e+37  ;;  %v655_v21 = vand.u32 2147483648, %v1473_v45  ;;  %v653_v37 = vand.u32 2147483647, %v1473_v45 }
 0x229   : > { %v656_v24 = vor.u32 1.1754944e-38, %v655_v21 }
 0x22a   : > { %v784_v28 = vpop.xlane.xlu2 %783 }
 0x22b   : > { %v786_v29 = vsub.f32 %v753_v7, %v784_v28 }
 0x22d   : > { %v1465_v30 = vpop.eup %1235  ;;  %v789_v31 = vmul.f32 1.442695, %v786_v29 }
 0x22e   : > { %v839_v32 = vsel %vm562_vm2, %v1465_v30, 0.0 }
 0x22f   : > { %1237 = vpow2.f32 %v789_v31  ;;  %840 = vadd.xlane.f32.xlu0 %v839_v32 }
 0x230   : > { %1239 = vrcp.f32 %v580_v33 }
 0x232   : > { %v832_v34 = vpop.xlane.xlu2 %831 }
 0x233   : > { %v834_v35 = vsub.f32 %v776_v12, %v832_v34 }
 0x235   : > { %v1469_v39 = vpop.eup %1237  ;;  %v837_v40 = vmul.f32 1.442695, %v834_v35 }
 0x236   : > { %v794_v44 = vsel %vm562_vm2, %v1469_v39, 0.0  ;;  %v1240_v47 = vpop.eup %1239 }
 0x237   : > { %1241 = vpow2.f32 %v837_v40  ;;  %795 = vadd.xlane.f32.xlu1 %v794_v44  ;;  %v597_v49 = vmul.f32 %v1240_v47, %v580_v33  ;;  %vm602_vm6 = vweird.f32 %v1240_v47 }
 0x238   : > { %vm603_vm9 = vmor %vm601_vm8, %vm602_vm6 }
 0x239   : > { %v598_v53 = vsub.f32 1.0, %v597_v49 }
 0x23a   : > { %v577_v46 = vpop.xlane.xlu2 %576 }
 0x23b   : > { %1243 = vrcp.f32 %v577_v46  ;;  %v592_v58 = vand.u32 2147483648, %v577_v46  ;;  %v599_v59 = vmul.f32 %v1240_v47, %v598_v53  ;;  %v590_v61 = vand.u32 2147483647, %v577_v46 }
 0x23c   : > { %1245 = vrcp.f32 %v1473_v45  ;;  %vm586_vm4 = vweird.f32 %v577_v46 }
 0x23d   : > { %v1476_v48 = vpop.eup %1241  ;;  %v593_v1 = vor.u32 1.1754944e-38, %v592_v58  ;;  %vm591_vm7 = vcmp.eq.f32.partialorder %v590_v61, 8.507059e+37  ;;  %v600_v42 = vadd.f32 %v1240_v47, %v599_v59 }
 0x23e   : > { %v842_v50 = vsel %vm562_vm2, %v1476_v48, 0.0 }
 0x23f   : > { %843 = vadd.xlane.f32.xlu2 %v842_v50  ;;  %v604_v13 = vsel %vm603_vm9, %v1240_v47, %v600_v42 }
 0x241   : > { %v1244_v51 = vpop.eup %1243 }
 0x242   : > { %v1480_v52 = vpop.eup %1245  ;;  %v582_v54 = vmul.f32 %v1244_v51, %v577_v46  ;;  %v625_v55 = vpop.xlane.xlu2 %624  ;;  %vm587_vm3 = vweird.f32 %v1244_v51 }
 0x243   : > { %1247 = vrcp.f32 %v625_v55  ;;  %1213 = vrot.lane.b32.xlu0 %v1212_v43, %s1265_s14  ;;  %v645_v57 = vmul.f32 %v1480_v52, %v1473_v45  ;;  %vm588_vm5 = vmor %vm586_vm4, %vm587_vm3  ;;  %v607_v43 = vand.u32 2147483648, %v580_v33  ;;  %v640_v10 = vand.u32 2147483648, %v625_v55 }
 0x244   : > { %v583_v56 = vsub.f32 1.0, %v582_v54  ;;  %v638_v12 = vand.u32 2147483647, %v625_v55  ;;  %vm634_vm11 = vweird.f32 %v625_v55  ;;  %vm650_vm15 = vweird.f32 %v1480_v52 }
 0x245   : > { %v646_v0 = vsub.f32 1.0, %v645_v57  ;;  %v608_v14 = vor.u32 1.1754944e-38, %v607_v43  ;;  %vm649_vm3 = vweird.f32 %v1473_v45 }
 0x246   : > { %v584_v60 = vmul.f32 %v1244_v51, %v583_v56  ;;  %vm639_vm14 = vcmp.eq.f32.partialorder %v638_v12, 8.507059e+37  ;;  %vm651_vm4 = vmor %vm649_vm3, %vm650_vm15 }
 0x247   : > { %v647_v9 = vmul.f32 %v1480_v52, %v646_v0  ;;  %v609_v17 = vsel %vm606_vm12, %v608_v14, %v604_v13 }
 0x248   : > { %v585_v62 = vadd.f32 %v1244_v51, %v584_v60  ;;  %v610_v23 = vmul.f32 %v1443_v2, %v609_v17 }
 0x249   : > { %v1248_v63 = vpop.eup %1247  ;;  %v648_v20 = vadd.f32 %v1480_v52, %v647_v9 }
 0x24a   : > { %v589_v3 = vsel %vm588_vm5, %v1244_v51, %v585_v62  ;;  %v630_v41 = vmul.f32 %v1248_v63, %v625_v55  ;;  %vm635_vm10 = vweird.f32 %v1248_v63  ;;  %vm654_vm5 = vcmp.eq.f32.partialorder %v653_v37, 8.507059e+37 }
 0x24b   : > { %v594_v4 = vsel %vm591_vm7, %v593_v1, %v589_v3  ;;  %vm636_vm13 = vmor %vm634_vm11, %vm635_vm10 }
 0x24c   : > { %v631_v6 = vsub.f32 1.0, %v630_v41  ;;  %v595_v7 = vmul.f32 %v1453_v16, %v594_v4  ;;  %v641_v16 = vor.u32 1.1754944e-38, %v640_v10 }
 0x24e   : > { %v632_v11 = vmul.f32 %v1248_v63, %v631_v6  ;;  %1172 = vmatmul.msk.f32.vlgmr.msra.gmra.mxu2 %vm562_vm2, %v595_v7 }
 0x250   : > { %v633_v15 = vadd.f32 %v1248_v63, %v632_v11  ;;  %1218 = vrot.lane.b32.xlu1 %v1217_v38, %s1265_s14  ;;  %v652_v38 = vsel %vm651_vm4, %v1480_v52, %v648_v20 }
 0x251   : > { %v657_v26 = vsel %vm654_vm5, %v656_v24, %v652_v38  ;;  %v952_v38 = vld [vmem:[%s1592_s6 + $0x18] sm:$0xff]  ;;  %v951_v24 = vld [vmem:[%s1592_s6 + $0x10] sm:$0xff] }
 0x252   : > { %v637_v19 = vsel %vm636_vm13, %v1248_v63, %v633_v15  ;;  %v658_v27 = vmul.f32 %v1447_v5, %v657_v26  ;;  %v950_v26 = vld [vmem:[%s1592_s6 + $0x8] sm:$0xff] }
 0x253   : > { %v642_v22 = vsel %vm639_vm14, %v641_v16, %v637_v19 }
 0x254   : > { %v643_v36 = vmul.f32 %v1457_v18, %v642_v22  ;;  %v956_v22 = vld [vmem:[%s1592_s6 + $0x38] sm:$0xff] }
 0x255   : > { %985 = vmatpush.msrb.mxu0 %v956_v22  ;;  %1024 = vmatpush.msrb.mxu1 %v956_v22 }
 0x256   : > { %1173 = vmatmul.msk.f32.gmra.mxu2 %vm562_vm2, %v610_v23  ;;  %1174 = vmatmul.msk.f32.vlgmr.msra.gmra.mxu3 %vm562_vm2, %v643_v36  ;;  %v955_v23 = vld [vmem:[%s1592_s6 + $0x30] sm:$0xff] }
 0x257   : > { %986 = vmatpush.msrb.mxu0 %v955_v23  ;;  %1025 = vmatpush.msrb.mxu1 %v955_v23 }
 0x25e   : > { %1175 = vmatmul.msk.f32.gmra.mxu3 %vm562_vm2, %v658_v27 }
 0x29a   : > { %v793_v28 = vpop.xlane.xlu2 %792 }
 0x29b   : > { %1249 = vrcp.f32 %v793_v28  ;;  %v808_v53 = vand.u32 2147483648, %v793_v28  ;;  %vm802_vm8 = vweird.f32 %v793_v28  ;;  %v806_v57 = vand.u32 2147483647, %v793_v28 }
 0x29d   : > { %v809_v62 = vor.u32 1.1754944e-38, %v808_v53  ;;  %vm807_vm12 = vcmp.eq.f32.partialorder %v806_v57, 8.507059e+37 }
 0x2a1   : > { %v1250_v18 = vpop.eup %1249 }
 0x2a2   : > { %v841_v2 = vpop.xlane.xlu0 %840  ;;  %v798_v32 = vmul.f32 %v1250_v18, %v793_v28  ;;  %vm803_vm6 = vweird.f32 %v1250_v18 }
 0x2a3   : > { %1251 = vrcp.f32 %v841_v2  ;;  %v856_v58 = vand.u32 2147483648, %v841_v2  ;;  %vm804_vm9 = vmor %vm802_vm8, %vm803_vm6  ;;  %vm850_vm10 = vweird.f32 %v841_v2  ;;  %v854_v59 = vand.u32 2147483647, %v841_v2 }
 0x2a4   : > { %v799_v34 = vsub.f32 1.0, %v798_v32  ;;  %v949_v32 = vld [vmem:[%s1592_s6] sm:$0xff] }
 0x2a5   : > { %v857_v3 = vor.u32 1.1754944e-38, %v856_v58  ;;  %vm855_vm13 = vcmp.eq.f32.partialorder %v854_v59, 8.507059e+37 }
 0x2a6   : > { %v800_v5 = vmul.f32 %v1250_v18, %v799_v34 }
 0x2a8   : > { %v801_v52 = vadd.f32 %v1250_v18, %v800_v5 }
 0x2a9   : > { %v1252_v31 = vpop.eup %1251 }
 0x2aa   : > { %v1507_v29 = vpop.xlane.xlu1 %795  ;;  %v846_v33 = vmul.f32 %v1252_v31, %v841_v2  ;;  %vm851_vm7 = vweird.f32 %v1252_v31  ;;  %v805_v61 = vsel %vm804_vm9, %v1250_v18, %v801_v52 }
 0x2ab   : > { %1253 = vrcp.f32 %v1507_v29  ;;  %vm852_vm11 = vmor %vm850_vm10, %vm851_vm7  ;;  %v810_v41 = vsel %vm807_vm12, %v809_v62, %v805_v61  ;;  %vm817_vm14 = vweird.f32 %v1507_v29  ;;  %v823_v43 = vand.u32 2147483648, %v1507_v29 }
 0x2ac   : > { %v847_v35 = vsub.f32 1.0, %v846_v33  ;;  %v811_v11 = vmul.f32 %v1461_v25, %v810_v41  ;;  %v821_v13 = vand.u32 2147483647, %v1507_v29 }
 0x2ad   : > { %v824_v25 = vor.u32 1.1754944e-38, %v823_v43 }
 0x2ae   : > { %v848_v46 = vmul.f32 %v1252_v31, %v847_v35  ;;  %vm822_vm7 = vcmp.eq.f32.partialorder %v821_v13, 8.507059e+37 }
 0x2b0   : > { %v849_v54 = vadd.f32 %v1252_v31, %v848_v46 }
 0x2b1   : > { %v1512_v44 = vpop.eup %1253 }
 0x2b2   : > { %v1510_v40 = vpop.xlane.xlu2 %843  ;;  %v813_v47 = vmul.f32 %v1512_v44, %v1507_v29  ;;  %v853_v63 = vsel %vm852_vm11, %v1252_v31, %v849_v54  ;;  %vm818_vm15 = vweird.f32 %v1512_v44 }
 0x2b3   : > { %1255 = vrcp.f32 %v1510_v40  ;;  %v858_v42 = vsel %vm855_vm13, %v857_v3, %v853_v63  ;;  %v871_v8 = vand.u32 2147483648, %v1510_v40  ;;  %vm865_vm4 = vweird.f32 %v1510_v40  ;;  %vm819_vm5 = vmor %vm817_vm14, %vm818_vm15 }
 0x2b4   : > { %v814_v55 = vsub.f32 1.0, %v813_v47  ;;  %v859_v12 = vmul.f32 %v1465_v30, %v858_v42  ;;  %v869_v14 = vand.u32 2147483647, %v1510_v40  ;;  %v1224_v47 = vld [vmem:[%s1593_s7] ss:$0 sm:$0xff] }
 0x2b5   : > { %v1214_v45 = vpop.permute.xlu0 %1213  ;;  %v872_v17 = vor.u32 1.1754944e-38, %v871_v8 }
 0x2b6   : > { %v1216_v49 = vunpack.i.h.bf16 %v1214_v45  ;;  %v1215_v50 = vunpack.i.l.bf16 %v1214_v45  ;;  %v815_v0 = vmul.f32 %v1512_v44, %v814_v55  ;;  %vm870_vm8 = vcmp.eq.f32.partialorder %v869_v14, 8.507059e+37 }
 0x2b8   : > { %903 = vmatpush.msrb.mxu2 %v1215_v50  ;;  %940 = vmatpush.msrb.mxu3 %v1216_v49  ;;  %v816_v6 = vadd.f32 %v1512_v44, %v815_v0 }
 0x2b9   : > { %v1256_v51 = vpop.eup %1255 }
 0x2ba   : > { %v861_v56 = vmul.f32 %v1256_v51, %v1510_v40  ;;  %vm866_vm3 = vweird.f32 %v1256_v51  ;;  %v820_v15 = vsel %vm819_vm5, %v1512_v44, %v816_v6 }
 0x2bb   : > { %vm867_vm6 = vmor %vm865_vm4, %vm866_vm3  ;;  %v825_v30 = vsel %vm822_vm7, %v824_v25, %v820_v15 }
 0x2bc   : > { %v862_v60 = vsub.f32 1.0, %v861_v56  ;;  %v826_v20 = vmul.f32 %v1469_v39, %v825_v30  ;;  %v954_v39 = vld [vmem:[%s1592_s6 + $0x28] sm:$0xff] }
 0x2bd   : > { %987 = vmatpush.msrb.mxu0 %v954_v39  ;;  %1026 = vmatpush.msrb.mxu1 %v954_v39 }
 0x2be   : > { %v863_v1 = vmul.f32 %v1256_v51, %v862_v60 }
 0x2c0   : > { %v864_v7 = vadd.f32 %v1256_v51, %v863_v1 }
 0x2c2   : > { %v1219_v4 = vpop.permute.xlu1 %1218  ;;  %v868_v16 = vsel %vm867_vm6, %v1256_v51, %v864_v7 }
 0x2c3   : > { %v1221_v9 = vunpack.i.h.bf16 %v1219_v4  ;;  %v1220_v10 = vunpack.i.l.bf16 %v1219_v4  ;;  %v873_v19 = vsel %vm870_vm8, %v872_v17, %v868_v16 }
 0x2c4   : > { %v874_v21 = vmul.f32 %v1476_v48, %v873_v19  ;;  %v953_v48 = vld [vmem:[%s1592_s6 + $0x20] sm:$0xff] }
 0x2c5   : > { %904 = vmatpush.msrb.mxu2 %v1220_v10  ;;  %941 = vmatpush.msrb.mxu3 %v1221_v9 }
 0x2c6   : > { %1184 = vmatmul.msk.f32.vlgmr.msrb.gmra.mxu2 %vm562_vm2, %v811_v11  ;;  %1186 = vmatmul.msk.f32.vlgmr.msrb.gmra.mxu3 %vm562_vm2, %v859_v12 }
 0x2c7   : > { %988 = vmatpush.msrb.mxu0 %v953_v48  ;;  %1027 = vmatpush.msrb.mxu1 %v953_v48 }
 0x2c9   : > { %989 = vmatpush.msrb.mxu0 %v952_v38  ;;  %1028 = vmatpush.msrb.mxu1 %v952_v38 }
 0x2cb   : > { %990 = vmatpush.msrb.mxu0 %v951_v24  ;;  %1029 = vmatpush.msrb.mxu1 %v951_v24 }
 0x2cd   : > { %991 = vmatpush.msrb.mxu0 %v950_v26  ;;  %1030 = vmatpush.msrb.mxu1 %v950_v26 }
 0x2ce   : > { %1185 = vmatmul.msk.f32.gmra.mxu2 %vm562_vm2, %v826_v20  ;;  %1187 = vmatmul.msk.f32.gmra.mxu3 %vm562_vm2, %v874_v21 }
 0x2cf   : > { %992 = vmatpush.msrb.mxu0 %v949_v32  ;;  %1031 = vmatpush.msrb.mxu1 %v949_v32 }
 0x2d1   : > { %v682_v36 = vpop.f32.mrf.mxu2 }
 0x2d9   : > { %v711_v37 = vpop.f32.mrf.mxu3  ;;  %v685_v27 = vpop.f32.mrf.mxu2 }
 0x2e1   : > { %v714_v28 = vpop.f32.mrf.mxu3 }
 0x349   : > { %v906_v2 = vpop.f32.mrf.mxu2  ;;  %v943_v18 = vpop.f32.mrf.mxu3 }
 0x34a   : > { %1002 = vrot.lane.b32.xlu0 %v943_v18, %s1266_s12  ;;  %960 = vrot.lane.b32.xlu2 %v906_v2, %s1266_s12 }
 0x351   : > { %v909_v29 = vpop.f32.mrf.mxu2  ;;  %v946_v31 = vpop.f32.mrf.mxu3 }
 0x352   : > { %962 = vrot.lane.b32.xlu1 %v909_v29, %s1266_s12  ;;  %1004 = vrot.lane.b32.xlu0 %v946_v31, %s1266_s12 }
 0x3a4   : > { %v961_v33 = vpop.permute.xlu2 %960 }
 0x3a5   : > { %v966_v34 = vsel %vm503_vm1, %v682_v36, %v961_v33 }
 0x3a6   : > { %1188 = vmatmul.msk.f32.vlgmr.msrb.gmra.mxu0 %vm391_vm0, %v966_v34 }
 0x3bc   : > { %v1003_v35 = vpop.permute.xlu0 %1002 }
 0x3bd   : > { %v1008_v40 = vsel %vm503_vm1, %v711_v37, %v1003_v35 }
 0x3be   : > { %1190 = vmatmul.msk.f32.vlgmr.msrb.gmra.mxu1 %vm391_vm0, %v1008_v40 }
 0x3c4   : > { %v963_v44 = vpop.permute.xlu1 %962  ;;  %v1005_v5 = vpop.permute.xlu0 %1004 }
 0x3c5   : > { %v967_v45 = vsel %vm503_vm1, %v685_v27, %v963_v44  ;;  %v1009_v46 = vsel %vm503_vm1, %v714_v28, %v1005_v5 }
 0x3c6   : > { %1189 = vmatmul.msk.f32.gmra.mxu0 %vm391_vm0, %v967_v45  ;;  %1191 = vmatmul.msk.f32.gmra.mxu1 %vm391_vm0, %v1009_v46 }
 0x423   : > { %v994_v49 = vpop.f32.mrf.mxu0 }
 0x424   : > { %v995_v50 = vadd.f32 %v1224_v47, %v994_v49 }
 0x426   : > { %1039 = vst.msk [vmem:[%s360_s18] sm:$0xff] %vm391_vm0, %v995_v50 }
 0x43b   : > { %v1033_v51 = vpop.f32.mrf.mxu1 }
 0x43c   : > { %v1034_v52 = vadd.f32 %v1224_v47, %v1033_v51 }
 0x43e   : > { %1041 = vst.msk [vmem:[%s365_s21] sm:$0xff] %vm391_vm0, %v1034_v52 }
 0x443   : > { %v997_v53 = vpop.f32.mrf.mxu0  ;;  %v1036_v54 = vpop.f32.mrf.mxu1 }
 0x444   : > { %v998_v55 = vadd.f32 %v1224_v47, %v997_v53  ;;  %v1037_v56 = vadd.f32 %v1224_v47, %v1036_v54 }
 0x446   : > { %1040 = vst.msk [vmem:[%s360_s18 + $0x8] sm:$0xff] %vm391_vm0, %v998_v55 }
 0x447   : > { %1042 = vst.msk [vmem:[%s365_s21 + $0x8] sm:$0xff] %vm391_vm0, %v1037_v56 }
 0x448 PF: > { %s20_s30 = sadd.s32 1, %s1263_s30  }
 0x449   : > { %p17_p4 = scmp.ge.s32.totalorder %s20_s30, 4  }
 0x44b   :  { %19 = sbr.rel (!%p17_p4) target bundleno = 1 (0x1), region = 97 }

</bundles_post_ra>
